<compile_context>
chip_gen: v6e
topology: v6e:2x2x1
jax: 0.10.0
libtpu: 0.0.40
codegen_flags: <defaults>
</compile_context>

<pallas_src>
import functools

import jax
import jax.numpy as jnp
from jax import lax
from jax.experimental import pallas as pl
from jax.experimental.pallas import tpu as pltpu


def _cdiv(a, b):
    return (a + b - 1) // b


def _round_up(a, m):
    return _cdiv(a, m) * m


def _vmem_capacity_bytes():
    try:
        info = pltpu.get_tpu_info()
        cap = getattr(info, "vmem_capacity_bytes", None)
        if cap:
            return int(cap)
    except Exception:
        pass
    return 64 * 1024 * 1024  # conservative (v7x per-TC VMEM)


def _layer_norm(acc, gamma, beta, eps):
    # torch.nn.LayerNorm: biased variance, eps inside the sqrt.
    mean = jnp.mean(acc, axis=-1, keepdims=True)
    var = jnp.mean((acc - mean) ** 2, axis=-1, keepdims=True)
    return (acc - mean) * lax.rsqrt(var + eps) * gamma + beta


def _resident_kernel(w2_ref, x_ref, w_ref, gamma_ref, beta_ref, o_ref, *, eps, n_feat):
    """Single grid step per token tile; full weight set resident in VMEM.

    w2_ref   : SMEM (F,)              proj2 scales (f32)
    x_ref    : VMEM (B, F, tile_t, C) activation tile (compute dtype)
    w_ref    : VMEM (F, D, C)         proj1 weights, native torch layout (compute dtype)
    gamma_ref: VMEM (1, D) f32, beta_ref: VMEM (1, D) f32
    o_ref    : VMEM (B, tile_t, D)
    """
    B, _, Tt, C = x_ref.shape
    D = w_ref.shape[1]
    M = B * Tt
    dims = (((1,), (1,)), ((), ()))  # (M,C) . (D,C)^T -> (M,D)

    acc = None
    for f in range(n_feat):  # static unroll; F is small (e.g. 7)
        xf = x_ref[:, f].reshape(M, C)
        part = lax.dot_general(xf, w_ref[f], dims,
                               preferred_element_type=jnp.float32)
        part = w2_ref[f] * part          # f32 scale on the f32 partial product
        acc = part if acc is None else acc + part

    out = _layer_norm(acc, gamma_ref[...], beta_ref[...], eps)
    o_ref[...] = out.reshape(B, Tt, D).astype(o_ref.dtype)


def _streamed_kernel(w2_ref, x_ref, w_ref, gamma_ref, beta_ref, o_ref, acc_ref, *, eps):
    """F is the innermost ("arbitrary") grid axis; one (D, C) weight slab per step.

    x_ref  : VMEM (B, tile_t, C)   (fine-feature dim squeezed)
    w_ref  : VMEM (D, C)           proj1[f] weight, native layout
    acc_ref: VMEM (B*tile_t, D)    f32 accumulator scratch (resident across F)
    """
    f = pl.program_id(1)
    B, Tt, C = x_ref.shape
    D = w_ref.shape[0]
    M = B * Tt
    dims = (((1,), (1,)), ((), ()))

    part = lax.dot_general(x_ref[...].reshape(M, C), w_ref[...], dims,
                           preferred_element_type=jnp.float32)

    @pl.when(f == 0)
    def _():
        acc_ref[...] = jnp.zeros_like(acc_ref)

    acc_ref[...] += w2_ref[f] * part

    @pl.when(f == pl.num_programs(1) - 1)
    def _():
        out = _layer_norm(acc_ref[...], gamma_ref[...], beta_ref[...], eps)
        o_ref[...] = out.reshape(B, Tt, D).astype(o_ref.dtype)


def modified_image_proj_model(image_embeds, w1, w2, gamma, beta, *,
                              row_tile=256, eps=1e-5,
                              compute_dtype=jnp.bfloat16, out_dtype=None,
                              weights_resident=None):
    """image_embeds: [B, F, T, C]
       w1:    [F, D, C]  (per-feature torch Linear weight, used in its native layout)
       w2:    [1, F] or [F]  (torch Linear(F, 1, bias=False).weight)
       gamma: [D], beta: [D]
       returns [B, T, D]
    """
    B, F, T, C = image_embeds.shape
    D = w1.shape[1]
    out_dtype = image_embeds.dtype if out_dtype is None else out_dtype
    compute_dtype = jnp.dtype(compute_dtype)

    # Balanced token tiles: never inflate T (e.g. 257) to the next multiple of row_tile.
    sub = max(8, 32 // compute_dtype.itemsize)          # 16 for bf16, 8 for f32
    n_t_tiles = max(1, _cdiv(T, row_tile))
    tile_t = _round_up(_cdiv(T, n_t_tiles), sub)
    t_pad = n_t_tiles * tile_t

    x = image_embeds
    if t_pad != T:
        x = jnp.pad(x, ((0, 0), (0, 0), (0, t_pad - T), (0, 0)))
    x = x.astype(compute_dtype)

    # No weight fold/transpose pass: w1 is consumed as-is.  The cast below is a no-op when the
    # caller stores weights in compute_dtype (recommended for repeated calls).
    w1c = w1 if w1.dtype == compute_dtype else w1.astype(compute_dtype)
    w2v = jnp.asarray(w2, jnp.float32).reshape((F,))    # f32 scales, read from SMEM in-kernel
    gamma2 = gamma.reshape(1, D).astype(jnp.float32)
    beta2 = beta.reshape(1, D).astype(jnp.float32)

    # Generation-aware VMEM budgeting (v5e/v6e: 128 MiB, v7x: 64 MiB per TC).
    vmem_cap = _vmem_capacity_bytes()
    vmem_limit = max(32 * 2**20, (vmem_cap * 7) // 8)   # leave headroom for compiler scratch
    itm = compute_dtype.itemsize
    out_itm = jnp.dtype(out_dtype).itemsize
    resident_bytes = (2 * B * F * tile_t * C * itm      # x block (double-buffered)
                      + 2 * F * D * C * itm             # full weight set (pessimistic 2x)
                      + 2 * B * tile_t * D * out_itm    # output block
                      + 4 * B * tile_t * D              # f32 accumulator temp
                      + 4 * D * 4 + 64 * 1024)          # gamma/beta + slack
    if weights_resident is None:
        weights_resident = resident_bytes <= (vmem_cap * 3) // 4

    smem_spec = pl.BlockSpec(memory_space=pltpu.MemorySpace.SMEM)

    if weights_resident:
        # Full weight set fetched once (constant index_map) and kept VMEM-resident;
        # F reduction unrolled in-kernel -> a single grid step per token tile.
        kernel = functools.partial(_resident_kernel, eps=eps, n_feat=F)
        grid = (n_t_tiles,)
        in_specs = [
            smem_spec,                                                  # w2 scales
            pl.BlockSpec((B, F, tile_t, C), lambda t: (0, 0, t, 0)),    # x
            pl.BlockSpec((F, D, C),         lambda t: (0, 0, 0)),       # w1 (resident)
            pl.BlockSpec((1, D),            lambda t: (0, 0)),          # gamma
            pl.BlockSpec((1, D),            lambda t: (0, 0)),          # beta
        ]
        out_specs = pl.BlockSpec((B, tile_t, D), lambda t: (0, t, 0))
        scratch_shapes = []
        dim_sem = ("parallel",)
    else:
        # Streamed fallback (e.g. v7x at CLIP-large dims): one (D, C) weight slab per F step.
        kernel = functools.partial(_streamed_kernel, eps=eps)
        grid = (n_t_tiles, F)                                           # F (reduction) innermost
        in_specs = [
            smem_spec,
            pl.BlockSpec((B, None, tile_t, C), lambda t, f: (0, f, t, 0)),
            pl.BlockSpec((None, D, C),         lambda t, f: (f, 0, 0)),
            pl.BlockSpec((1, D),               lambda t, f: (0, 0)),
            pl.BlockSpec((1, D),               lambda t, f: (0, 0)),
        ]
        out_specs = pl.BlockSpec((B, tile_t, D), lambda t, f: (0, t, 0))
        scratch_shapes = [pltpu.VMEM((B * tile_t, D), jnp.float32)]
        dim_sem = ("parallel", "arbitrary")

    out = pl.pallas_call(
        kernel,
        out_shape=jax.ShapeDtypeStruct((B, t_pad, D), out_dtype),
        grid_spec=pltpu.PrefetchScalarGridSpec(
            num_scalar_prefetch=0,
            grid=grid,
            in_specs=in_specs,
            out_specs=out_specs,
            scratch_shapes=scratch_shapes,
        ),
        compiler_params=pltpu.CompilerParams(
            dimension_semantics=dim_sem,
            vmem_limit_bytes=int(vmem_limit),
        ),
    )(w2v, x, w1c, gamma2, beta2)

    if t_pad != T:
        out = out[:, :T, :]
    return out


def _reference(image_embeds, w1, w2, gamma, beta, eps=1e-5):
    B, F, T, C = image_embeds.shape
    rescale = jnp.stack(
        [image_embeds[:, i] @ w1[i].T for i in range(F)], axis=-1)   # [B,T,D,F]
    mean_embeds = jnp.einsum("btdf,f->btd", rescale, w2.reshape(F))
    mu = jnp.mean(mean_embeds, axis=-1, keepdims=True)
    var = jnp.mean((mean_embeds - mu) ** 2, axis=-1, keepdims=True)
    return (mean_embeds - mu) / jnp.sqrt(var + eps) * gamma + beta


if __name__ == "__main__":
    # Small shapes consistent with the module's forward:
    # batch=2, number_fine_features=7, tokens=16, clip_dim=128, cross_dim=256.
    B, F, T, C, D = 2, 7, 16, 128, 256

    key = jax.random.PRNGKey(0)
    k_x, k_w1, k_w2, k_g, k_b, k_x2 = jax.random.split(key, 6)

    image_embeds = jax.random.normal(k_x, (B, F, T, C), dtype=jnp.float32)
    w1 = jax.random.normal(k_w1, (F, D, C), dtype=jnp.float32) * 0.05    # proj1[i].weight
    w2 = jax.random.normal(k_w2, (1, F), dtype=jnp.float32) * 0.3        # proj2.weight
    gamma = 1.0 + 0.1 * jax.random.normal(k_g, (D,), dtype=jnp.float32)  # norm.weight
    beta = 0.1 * jax.random.normal(k_b, (D,), dtype=jnp.float32)         # norm.bias

    ref = _reference(image_embeds, w1, w2, gamma, beta)

    # f32 compute (auto -> resident weights, single grid step): tight check of fused math.
    out_f32 = jax.block_until_ready(
        modified_image_proj_model(image_embeds, w1, w2, gamma, beta,
                                  compute_dtype=jnp.float32))
    assert out_f32.shape == (B, T, D)
    assert jnp.allclose(out_f32, ref, atol=2e-3, rtol=2e-3), "f32 mismatch vs reference"

    # bf16 compute (performance configuration: MXU-native operands, f32 accumulation/scales).
    out_bf16 = jax.block_until_ready(
        modified_image_proj_model(image_embeds, w1, w2, gamma, beta,
                                  compute_dtype=jnp.bfloat16))
    assert out_bf16.shape == (B, T, D)
    assert jnp.allclose(out_bf16.astype(jnp.float32), ref, atol=5e-2, rtol=5e-2), \
        "bf16 mismatch vs reference"

    # Multi-tile + padded token count (T=20, row_tile=16 -> 2 balanced tiles), both paths.
    T2 = 20
    x2 = jax.random.normal(k_x2, (B, F, T2, C), dtype=jnp.float32)
    ref2 = _reference(x2, w1, w2, gamma, beta)

    out_res2 = jax.block_until_ready(
        modified_image_proj_model(x2, w1, w2, gamma, beta, compute_dtype=jnp.float32,
                                  row_tile=16, weights_resident=True))
    assert out_res2.shape == (B, T2, D)
    assert jnp.allclose(out_res2, ref2, atol=2e-3, rtol=2e-3), "resident multi-tile mismatch"

    out_str2 = jax.block_until_ready(
        modified_image_proj_model(x2, w1, w2, gamma, beta, compute_dtype=jnp.float32,
                                  row_tile=16, weights_resident=False))
    assert out_str2.shape == (B, T2, D)
    assert jnp.allclose(out_str2, ref2, atol=2e-3, rtol=2e-3), "streamed multi-tile mismatch"

    print("KERNEL_OK")
</pallas_src>

<mosaic_0001>
module attributes {stable_mosaic.version = 11 : i64} {
  func.func @_resident_kernel(%arg0: i32, %arg1: memref<7xf32, #tpu.memory_space<smem>>, %arg2: memref<2x7x16x128xf32, #tpu.memory_space<vmem>>, %arg3: memref<7x256x128xf32, #tpu.memory_space<vmem>>, %arg4: memref<1x256xf32, #tpu.memory_space<vmem>>, %arg5: memref<1x256xf32, #tpu.memory_space<vmem>>, %arg6: memref<2x16x256xf32, #tpu.memory_space<vmem>>) attributes {dimension_semantics = [#tpu.dimension_semantics<parallel>], iteration_bounds = array<i64: 1>, scalar_prefetch = 0 : i64, scratch_operands = 0 : i64, tpu.core_type = #tpu.core_type<tc>, window_params = [{transform_indices = @transform_0, window_bounds = array<i64: 7>}, {transform_indices = @transform_1, window_bounds = array<i64: 2, 7, 16, 128>}, {pipeline_mode = #tpu.pipeline_mode<synchronous>, transform_indices = @transform_2, window_bounds = array<i64: 7, 256, 128>}, {pipeline_mode = #tpu.pipeline_mode<synchronous>, transform_indices = @transform_3, window_bounds = array<i64: 1, 256>}, {pipeline_mode = #tpu.pipeline_mode<synchronous>, transform_indices = @transform_4, window_bounds = array<i64: 1, 256>}, {transform_indices = @transform_5, window_bounds = array<i64: 2, 16, 256>}]} {
    %c0 = arith.constant 0 : index
    %c0_0 = arith.constant 0 : index
    %c0_1 = arith.constant 0 : index
    %c0_2 = arith.constant 0 : index
    %0 = vector.load %arg2[%c0, %c0_0, %c0_1, %c0_2] : memref<2x7x16x128xf32, #tpu.memory_space<vmem>>, vector<2x1x16x128xf32>
    %1 = vector.shape_cast %0 : vector<2x1x16x128xf32> to vector<2x16x128xf32>
    %2 = vector.shape_cast %1 : vector<2x16x128xf32> to vector<32x128xf32>
    %c0_3 = arith.constant 0 : index
    %c0_4 = arith.constant 0 : index
    %c0_5 = arith.constant 0 : index
    %3 = vector.load %arg3[%c0_3, %c0_4, %c0_5] : memref<7x256x128xf32, #tpu.memory_space<vmem>>, vector<1x256x128xf32>
    %4 = vector.shape_cast %3 : vector<1x256x128xf32> to vector<256x128xf32>
    %cst = arith.constant dense<0.000000e+00> : vector<32x256xf32>
    %5 = tpu.matmul %2, %4, %cst {dimension_numbers = #tpu.dot_dimension_numbers<[1], [1], [0], [0], [0, 0, 1, 0], [], []>} : vector<32x128xf32>, vector<256x128xf32>, vector<32x256xf32> -> vector<32x256xf32>
    %c0_6 = arith.constant 0 : index
    %6 = memref.load %arg1[%c0_6] : memref<7xf32, #tpu.memory_space<smem>>
    %7 = vector.broadcast %6 : f32 to vector<32x256xf32>
    %8 = arith.mulf %7, %5 : vector<32x256xf32>
    %c0_7 = arith.constant 0 : index
    %c1 = arith.constant 1 : index
    %c0_8 = arith.constant 0 : index
    %c0_9 = arith.constant 0 : index
    %9 = vector.load %arg2[%c0_7, %c1, %c0_8, %c0_9] : memref<2x7x16x128xf32, #tpu.memory_space<vmem>>, vector<2x1x16x128xf32>
    %10 = vector.shape_cast %9 : vector<2x1x16x128xf32> to vector<2x16x128xf32>
    %11 = vector.shape_cast %10 : vector<2x16x128xf32> to vector<32x128xf32>
    %c1_10 = arith.constant 1 : index
    %c0_11 = arith.constant 0 : index
    %c0_12 = arith.constant 0 : index
    %12 = vector.load %arg3[%c1_10, %c0_11, %c0_12] : memref<7x256x128xf32, #tpu.memory_space<vmem>>, vector<1x256x128xf32>
    %13 = vector.shape_cast %12 : vector<1x256x128xf32> to vector<256x128xf32>
    %cst_13 = arith.constant dense<0.000000e+00> : vector<32x256xf32>
    %14 = tpu.matmul %11, %13, %cst_13 {dimension_numbers = #tpu.dot_dimension_numbers<[1], [1], [0], [0], [0, 0, 1, 0], [], []>} : vector<32x128xf32>, vector<256x128xf32>, vector<32x256xf32> -> vector<32x256xf32>
    %c1_14 = arith.constant 1 : index
    %15 = memref.load %arg1[%c1_14] : memref<7xf32, #tpu.memory_space<smem>>
    %16 = vector.broadcast %15 : f32 to vector<32x256xf32>
    %17 = arith.mulf %16, %14 : vector<32x256xf32>
    %18 = arith.addf %8, %17 : vector<32x256xf32>
    %c0_15 = arith.constant 0 : index
    %c2 = arith.constant 2 : index
    %c0_16 = arith.constant 0 : index
    %c0_17 = arith.constant 0 : index
    %19 = vector.load %arg2[%c0_15, %c2, %c0_16, %c0_17] : memref<2x7x16x128xf32, #tpu.memory_space<vmem>>, vector<2x1x16x128xf32>
    %20 = vector.shape_cast %19 : vector<2x1x16x128xf32> to vector<2x16x128xf32>
    %21 = vector.shape_cast %20 : vector<2x16x128xf32> to vector<32x128xf32>
    %c2_18 = arith.constant 2 : index
    %c0_19 = arith.constant 0 : index
    %c0_20 = arith.constant 0 : index
    %22 = vector.load %arg3[%c2_18, %c0_19, %c0_20] : memref<7x256x128xf32, #tpu.memory_space<vmem>>, vector<1x256x128xf32>
    %23 = vector.shape_cast %22 : vector<1x256x128xf32> to vector<256x128xf32>
    %cst_21 = arith.constant dense<0.000000e+00> : vector<32x256xf32>
    %24 = tpu.matmul %21, %23, %cst_21 {dimension_numbers = #tpu.dot_dimension_numbers<[1], [1], [0], [0], [0, 0, 1, 0], [], []>} : vector<32x128xf32>, vector<256x128xf32>, vector<32x256xf32> -> vector<32x256xf32>
    %c2_22 = arith.constant 2 : index
    %25 = memref.load %arg1[%c2_22] : memref<7xf32, #tpu.memory_space<smem>>
    %26 = vector.broadcast %25 : f32 to vector<32x256xf32>
    %27 = arith.mulf %26, %24 : vector<32x256xf32>
    %28 = arith.addf %18, %27 : vector<32x256xf32>
    %c0_23 = arith.constant 0 : index
    %c3 = arith.constant 3 : index
    %c0_24 = arith.constant 0 : index
    %c0_25 = arith.constant 0 : index
    %29 = vector.load %arg2[%c0_23, %c3, %c0_24, %c0_25] : memref<2x7x16x128xf32, #tpu.memory_space<vmem>>, vector<2x1x16x128xf32>
    %30 = vector.shape_cast %29 : vector<2x1x16x128xf32> to vector<2x16x128xf32>
    %31 = vector.shape_cast %30 : vector<2x16x128xf32> to vector<32x128xf32>
    %c3_26 = arith.constant 3 : index
    %c0_27 = arith.constant 0 : index
    %c0_28 = arith.constant 0 : index
    %32 = vector.load %arg3[%c3_26, %c0_27, %c0_28] : memref<7x256x128xf32, #tpu.memory_space<vmem>>, vector<1x256x128xf32>
    %33 = vector.shape_cast %32 : vector<1x256x128xf32> to vector<256x128xf32>
    %cst_29 = arith.constant dense<0.000000e+00> : vector<32x256xf32>
    %34 = tpu.matmul %31, %33, %cst_29 {dimension_numbers = #tpu.dot_dimension_numbers<[1], [1], [0], [0], [0, 0, 1, 0], [], []>} : vector<32x128xf32>, vector<256x128xf32>, vector<32x256xf32> -> vector<32x256xf32>
    %c3_30 = arith.constant 3 : index
    %35 = memref.load %arg1[%c3_30] : memref<7xf32, #tpu.memory_space<smem>>
    %36 = vector.broadcast %35 : f32 to vector<32x256xf32>
    %37 = arith.mulf %36, %34 : vector<32x256xf32>
    %38 = arith.addf %28, %37 : vector<32x256xf32>
    %c0_31 = arith.constant 0 : index
    %c4 = arith.constant 4 : index
    %c0_32 = arith.constant 0 : index
    %c0_33 = arith.constant 0 : index
    %39 = vector.load %arg2[%c0_31, %c4, %c0_32, %c0_33] : memref<2x7x16x128xf32, #tpu.memory_space<vmem>>, vector<2x1x16x128xf32>
    %40 = vector.shape_cast %39 : vector<2x1x16x128xf32> to vector<2x16x128xf32>
    %41 = vector.shape_cast %40 : vector<2x16x128xf32> to vector<32x128xf32>
    %c4_34 = arith.constant 4 : index
    %c0_35 = arith.constant 0 : index
    %c0_36 = arith.constant 0 : index
    %42 = vector.load %arg3[%c4_34, %c0_35, %c0_36] : memref<7x256x128xf32, #tpu.memory_space<vmem>>, vector<1x256x128xf32>
    %43 = vector.shape_cast %42 : vector<1x256x128xf32> to vector<256x128xf32>
    %cst_37 = arith.constant dense<0.000000e+00> : vector<32x256xf32>
    %44 = tpu.matmul %41, %43, %cst_37 {dimension_numbers = #tpu.dot_dimension_numbers<[1], [1], [0], [0], [0, 0, 1, 0], [], []>} : vector<32x128xf32>, vector<256x128xf32>, vector<32x256xf32> -> vector<32x256xf32>
    %c4_38 = arith.constant 4 : index
    %45 = memref.load %arg1[%c4_38] : memref<7xf32, #tpu.memory_space<smem>>
    %46 = vector.broadcast %45 : f32 to vector<32x256xf32>
    %47 = arith.mulf %46, %44 : vector<32x256xf32>
    %48 = arith.addf %38, %47 : vector<32x256xf32>
    %c0_39 = arith.constant 0 : index
    %c5 = arith.constant 5 : index
    %c0_40 = arith.constant 0 : index
    %c0_41 = arith.constant 0 : index
    %49 = vector.load %arg2[%c0_39, %c5, %c0_40, %c0_41] : memref<2x7x16x128xf32, #tpu.memory_space<vmem>>, vector<2x1x16x128xf32>
    %50 = vector.shape_cast %49 : vector<2x1x16x128xf32> to vector<2x16x128xf32>
    %51 = vector.shape_cast %50 : vector<2x16x128xf32> to vector<32x128xf32>
    %c5_42 = arith.constant 5 : index
    %c0_43 = arith.constant 0 : index
    %c0_44 = arith.constant 0 : index
    %52 = vector.load %arg3[%c5_42, %c0_43, %c0_44] : memref<7x256x128xf32, #tpu.memory_space<vmem>>, vector<1x256x128xf32>
    %53 = vector.shape_cast %52 : vector<1x256x128xf32> to vector<256x128xf32>
    %cst_45 = arith.constant dense<0.000000e+00> : vector<32x256xf32>
    %54 = tpu.matmul %51, %53, %cst_45 {dimension_numbers = #tpu.dot_dimension_numbers<[1], [1], [0], [0], [0, 0, 1, 0], [], []>} : vector<32x128xf32>, vector<256x128xf32>, vector<32x256xf32> -> vector<32x256xf32>
    %c5_46 = arith.constant 5 : index
    %55 = memref.load %arg1[%c5_46] : memref<7xf32, #tpu.memory_space<smem>>
    %56 = vector.broadcast %55 : f32 to vector<32x256xf32>
    %57 = arith.mulf %56, %54 : vector<32x256xf32>
    %58 = arith.addf %48, %57 : vector<32x256xf32>
    %c0_47 = arith.constant 0 : index
    %c6 = arith.constant 6 : index
    %c0_48 = arith.constant 0 : index
    %c0_49 = arith.constant 0 : index
    %59 = vector.load %arg2[%c0_47, %c6, %c0_48, %c0_49] : memref<2x7x16x128xf32, #tpu.memory_space<vmem>>, vector<2x1x16x128xf32>
    %60 = vector.shape_cast %59 : vector<2x1x16x128xf32> to vector<2x16x128xf32>
    %61 = vector.shape_cast %60 : vector<2x16x128xf32> to vector<32x128xf32>
    %c6_50 = arith.constant 6 : index
    %c0_51 = arith.constant 0 : index
    %c0_52 = arith.constant 0 : index
    %62 = vector.load %arg3[%c6_50, %c0_51, %c0_52] : memref<7x256x128xf32, #tpu.memory_space<vmem>>, vector<1x256x128xf32>
    %63 = vector.shape_cast %62 : vector<1x256x128xf32> to vector<256x128xf32>
    %cst_53 = arith.constant dense<0.000000e+00> : vector<32x256xf32>
    %64 = tpu.matmul %61, %63, %cst_53 {dimension_numbers = #tpu.dot_dimension_numbers<[1], [1], [0], [0], [0, 0, 1, 0], [], []>} : vector<32x128xf32>, vector<256x128xf32>, vector<32x256xf32> -> vector<32x256xf32>
    %c6_54 = arith.constant 6 : index
    %65 = memref.load %arg1[%c6_54] : memref<7xf32, #tpu.memory_space<smem>>
    %66 = vector.broadcast %65 : f32 to vector<32x256xf32>
    %67 = arith.mulf %66, %64 : vector<32x256xf32>
    %68 = arith.addf %58, %67 : vector<32x256xf32>
    %c0_55 = arith.constant 0 : index
    %c0_56 = arith.constant 0 : index
    %69 = vector.load %arg4[%c0_55, %c0_56] : memref<1x256xf32, #tpu.memory_space<vmem>>, vector<1x256xf32>
    %c0_57 = arith.constant 0 : index
    %c0_58 = arith.constant 0 : index
    %70 = vector.load %arg5[%c0_57, %c0_58] : memref<1x256xf32, #tpu.memory_space<vmem>>, vector<1x256xf32>
    %cst_59 = arith.constant dense<0.000000e+00> : vector<32xf32>
    %71 = vector.multi_reduction <add>, %68, %cst_59 [1] : vector<32x256xf32> to vector<32xf32>
    %72 = vector.shape_cast %71 : vector<32xf32> to vector<32x1xf32>
    %cst_60 = arith.constant 2.560000e+02 : f32
    %73 = vector.broadcast %cst_60 : f32 to vector<32x1xf32>
    %74 = arith.divf %72, %73 : vector<32x1xf32>
    %75 = vector.broadcast %74 : vector<32x1xf32> to vector<32x256xf32>
    %76 = arith.subf %68, %75 : vector<32x256xf32>
    %77 = arith.mulf %76, %76 : vector<32x256xf32>
    %cst_61 = arith.constant dense<0.000000e+00> : vector<32xf32>
    %78 = vector.multi_reduction <add>, %77, %cst_61 [1] : vector<32x256xf32> to vector<32xf32>
    %79 = vector.shape_cast %78 : vector<32xf32> to vector<32x1xf32>
    %cst_62 = arith.constant 2.560000e+02 : f32
    %80 = vector.broadcast %cst_62 : f32 to vector<32x1xf32>
    %81 = arith.divf %79, %80 : vector<32x1xf32>
    %82 = vector.broadcast %74 : vector<32x1xf32> to vector<32x256xf32>
    %83 = arith.subf %68, %82 : vector<32x256xf32>
    %cst_63 = arith.constant 9.99999974E-6 : f32
    %84 = vector.broadcast %cst_63 : f32 to vector<32x1xf32>
    %85 = arith.addf %81, %84 : vector<32x1xf32>
    %86 = math.rsqrt %85 : vector<32x1xf32>
    %87 = vector.broadcast %86 : vector<32x1xf32> to vector<32x256xf32>
    %88 = arith.mulf %83, %87 : vector<32x256xf32>
    %89 = vector.broadcast %69 : vector<1x256xf32> to vector<32x256xf32>
    %90 = arith.mulf %88, %89 : vector<32x256xf32>
    %91 = vector.broadcast %70 : vector<1x256xf32> to vector<32x256xf32>
    %92 = arith.addf %90, %91 : vector<32x256xf32>
    %93 = vector.shape_cast %92 : vector<32x256xf32> to vector<2x16x256xf32>
    %c0_64 = arith.constant 0 : index
    %c0_65 = arith.constant 0 : index
    %c0_66 = arith.constant 0 : index
    %94 = vector.load %arg6[%c0_64, %c0_65, %c0_66] : memref<2x16x256xf32, #tpu.memory_space<vmem>>, vector<2x16x256xf32>
    tpu.vector_store %arg6[%c0_64, %c0_65, %c0_66], %93 {strides = array<i32>} : memref<2x16x256xf32, #tpu.memory_space<vmem>>, vector<2x16x256xf32>,
    return
  }
  func.func @transform_0(%arg0: i32) -> i32 {
    %c0_i32 = arith.constant 0 : i32
    %c0_i32_0 = arith.constant 0 : i32
    return %c0_i32 : i32
  }
  func.func @transform_1(%arg0: i32) -> (i32, i32, i32, i32) {
    %c0_i32 = arith.constant 0 : i32
    %c0_i32_0 = arith.constant 0 : i32
    %c0_i32_1 = arith.constant 0 : i32
    %c0_i32_2 = arith.constant 0 : i32
    return %c0_i32, %c0_i32_0, %arg0, %c0_i32_1 : i32, i32, i32, i32
  }
  func.func @transform_2(%arg0: i32) -> (i32, i32, i32) {
    %c0_i32 = arith.constant 0 : i32
    %c0_i32_0 = arith.constant 0 : i32
    %c0_i32_1 = arith.constant 0 : i32
    %c0_i32_2 = arith.constant 0 : i32
    return %c0_i32, %c0_i32_0, %c0_i32_1 : i32, i32, i32
  }
  func.func @transform_3(%arg0: i32) -> (i32, i32) {
    %c0_i32 = arith.constant 0 : i32
    %c0_i32_0 = arith.constant 0 : i32
    %c0_i32_1 = arith.constant 0 : i32
    return %c0_i32, %c0_i32_0 : i32, i32
  }
  func.func @transform_4(%arg0: i32) -> (i32, i32) {
    %c0_i32 = arith.constant 0 : i32
    %c0_i32_0 = arith.constant 0 : i32
    %c0_i32_1 = arith.constant 0 : i32
    return %c0_i32, %c0_i32_0 : i32, i32
  }
  func.func @transform_5(%arg0: i32) -> (i32, i32, i32) {
    %c0_i32 = arith.constant 0 : i32
    %c0_i32_0 = arith.constant 0 : i32
    %c0_i32_1 = arith.constant 0 : i32
    return %c0_i32, %arg0, %c0_i32_0 : i32, i32, i32
  }
}

</mosaic_0001>

<bundles_post_ra>
// kernel: tpu_custom_call.1
= control target key start
LH: loop header
LB: loop body
LE: loop exit
PB: predicated region body
PF: predicated region fallthrough
CT: control target
= control target key end

     0   :  { %10 = vsyncpa [#allocation5], 0  ;;  %s1809_s0 = inlined_call_operand.hbm [shape: f32[7], index: 0, kind: input, shape index: {}]   ;;  %s1810_s1 = inlined_call_operand.hbm [shape: f32[2,7,16,128], index: 1, kind: input, shape index: {}]   ;;  %s1811_s2 = inlined_call_operand.hbm [shape: f32[7,256,128], index: 2, kind: input, shape index: {}]   ;;  %s1812_s3 = inlined_call_operand.vmem [shape: f32[1,256], index: 3, kind: input, shape index: {}]   ;;  %s1813_s4 = inlined_call_operand.vmem [shape: f32[1,256], index: 4, kind: input, shape index: {}]   ;;  %s1814_s5 = inlined_call_operand.hbm [shape: f32[2,16,256], index: 5, kind: output, shape index: {}]  }
   0x1   :  { %11 = vsyncpa [#allocation3], 0 }
   0x2   :  { %12 = vsyncpa [#allocation8], 0 }
   0x3   :  { %13 = vsyncpa [#allocation4], 0  ;;  %s1607_s18 = smov [#allocation2]   ;;  %s1608_s21 = smov [#allocation6]  }
   0x4   :  { %21 = dma.hbm_to_smem %s1809_s0, 16, %s1607_s18, [#allocation5]  }
   0x5   :  { %s27_s22 = sshll.u32 %s1608_s21, 4  ;;  %s28_s22 = int_to_ptr.vmem [resolvable:$true] %s27_s22 }
   0x6   :  { %s1547_s23 = scalar_lea.vmem %s28_s22, 3584  ;;  %p1552_p1 = scmp.lt.s32.totalorder %s28_s22, %s28_s22 }
   0x7   :  { %p1548_p0 = scmp.ne.s32.totalorder %s28_s22, %s1547_s23  ;;  %p1553_p2 = scmp.lt.s32.totalorder %s1547_s23, %s1547_s23 }
   0x9   :  { %p1554_p3 = por %p1553_p2, %p1552_p1 }
   0xb   :  { %p1555_p4 = pnand %p1554_p3, %p1548_p0 }
   0xd   :  { %1558 = shalt.err (!%p1555_p4)
}
   0xe   :  { %s1609_s24 = smov 128   ;;  %s1610_s25 = smov 8  }
   0xf   :  { %33 = dma.hbm_to_vmem [thread:$0]  %s1810_s1, 3584, %s28_s22, [#allocation3], %s1609_s24, %s1609_s24, %s1610_s25  }
  0x10   :  { %s1611_s28 = smov [#allocation7]  }
  0x11   :  { %s39_s29 = sshll.u32 %s1611_s28, 4  ;;  %s40_s29 = int_to_ptr.vmem [resolvable:$true] %s39_s29 }
  0x12   :  { %s1567_s0 = scalar_lea.vmem %s40_s29, 28672  ;;  %p1572_p6 = scmp.lt.s32.totalorder %s40_s29, %s40_s29 }
  0x13   :  { %p1568_p5 = scmp.ne.s32.totalorder %s40_s29, %s1567_s0  ;;  %p1573_p7 = scmp.lt.s32.totalorder %s1567_s0, %s1567_s0 }
  0x15   :  { %p1574_p8 = por %p1573_p7, %p1572_p6 }
  0x17   :  { %p1575_p9 = pnand %p1574_p8, %p1568_p5 }
  0x19   :  { %1578 = shalt.err (!%p1575_p9)
}
  0x1a   :  { %45 = dma.hbm_to_vmem [thread:$0]  %s1811_s2, 28672, %s40_s29, [#allocation8], %s1609_s24, %s1609_s24, %s1610_s25  }
  0x1b   :  { %1599 = dma.done.wait [#allocation5], 16  }
  0x1c   :  { %1600 = vsyncadd [#allocation5], 4294967280 }
  0x1d   :  { %1601 = dma.done.wait [#allocation3], 3584  }
  0x1e   :  { %1602 = vsyncadd [#allocation3], 4294963712 }
  0x1f   :  { %1603 = dma.done.wait [#allocation8], 28672  }
  0x20   :  { %1604 = vsyncadd [#allocation8], 4294938624 }
  0x21   :  { %59 = sfence }
  0x22   :  { %v95_v0 = vld [vmem:[#allocation7 + $0xf8] sm:$0xff]  ;;  %v94_v4 = vld [vmem:[#allocation7 + $0xf0] sm:$0xff]  ;;  %v93_v8 = vld [vmem:[#allocation7 + $0xe8] sm:$0xff]  ;;  %s185_s1 = sld [smem:[#allocation2]] }
  0x23   :  { %v232_v1 = vld [vmem:[#allocation7 + $0x1f8] sm:$0xff]  ;;  %1203 = vmatprep.subr.mxu0 %v95_v0  ;;  %v231_v5 = vld [vmem:[#allocation7 + $0x1f0] sm:$0xff]  ;;  %v230_v9 = vld [vmem:[#allocation7 + $0x1e8] sm:$0xff]  ;;  %s1197_s2 = sld [smem:[#allocation2 + $0x1]] }
  0x24   :  { %v79_v2 = vld [vmem:[#allocation7 + $0x78] sm:$0xff]  ;;  %1243 = vmatprep.subr.mxu1 %v232_v1  ;;  %v78_v6 = vld [vmem:[#allocation7 + $0x70] sm:$0xff]  ;;  %v77_v10 = vld [vmem:[#allocation7 + $0x68] sm:$0xff]  ;;  %s1198_s7 = sld [smem:[#allocation2 + $0x2]] }
  0x25   :  { %v216_v3 = vld [vmem:[#allocation7 + $0x178] sm:$0xff]  ;;  %1204 = vmatpush3.xpose.msra.mxu0 %v79_v2  ;;  %v215_v7 = vld [vmem:[#allocation7 + $0x170] sm:$0xff]  ;;  %v214_v11 = vld [vmem:[#allocation7 + $0x168] sm:$0xff]  ;;  %s1199_s8 = sld [smem:[#allocation2 + $0x3]] }
  0x26   :  { %1244 = vmatpush3.xpose.msra.mxu1 %v216_v3  ;;  %1205 = vmatprep.subr.mxu0 %v94_v4  ;;  %v92_v12 = vld [vmem:[#allocation7 + $0xe0] sm:$0xff]  ;;  %v91_v16 = vld [vmem:[#allocation7 + $0xd8] sm:$0xff]  ;;  %v90_v20 = vld [vmem:[#allocation7 + $0xd0] sm:$0xff]  ;;  %s1200_s9 = sld [smem:[#allocation2 + $0x4]] }
  0x27   :  { %1245 = vmatprep.subr.mxu1 %v231_v5  ;;  %v229_v13 = vld [vmem:[#allocation7 + $0x1e0] sm:$0xff]  ;;  %v228_v17 = vld [vmem:[#allocation7 + $0x1d8] sm:$0xff]  ;;  %v227_v21 = vld [vmem:[#allocation7 + $0x1d0] sm:$0xff]  ;;  %s1201_s10 = sld [smem:[#allocation2 + $0x5]] }
  0x28   :  { %v76_v14 = vld [vmem:[#allocation7 + $0x60] sm:$0xff]  ;;  %v75_v18 = vld [vmem:[#allocation7 + $0x58] sm:$0xff]  ;;  %v74_v22 = vld [vmem:[#allocation7 + $0x50] sm:$0xff]  ;;  %s1724_s11 = sld [smem:[#allocation2 + $0x6]] }
  0x29   :  { %1206 = vmatpush3.xpose.msra.mxu0 %v78_v6  ;;  %v213_v15 = vld [vmem:[#allocation7 + $0x160] sm:$0xff]  ;;  %v212_v19 = vld [vmem:[#allocation7 + $0x158] sm:$0xff]  ;;  %v211_v23 = vld [vmem:[#allocation7 + $0x150] sm:$0xff] }
  0x2a   :  { %1246 = vmatpush3.xpose.msra.mxu1 %v215_v7  ;;  %1207 = vmatprep.subr.mxu0 %v93_v8  ;;  %v89_v24 = vld [vmem:[#allocation7 + $0xc8] sm:$0xff]  ;;  %v1654_v26 = vld [vmem:[#allocation6] sm:$0xff]  ;;  %v1656_v27 = vld [vmem:[#allocation6 + $0x10] sm:$0xff] }
  0x2b   :  { %1247 = vmatprep.subr.mxu1 %v230_v9  ;;  %v226_v25 = vld [vmem:[#allocation7 + $0x1c8] sm:$0xff]  ;;  %v88_v30 = vld [vmem:[#allocation7 + $0xc0] sm:$0xff]  ;;  %1235 = vmatprep.mubr.f32.mxu0 %v1654_v26  ;;  %v87_v34 = vld [vmem:[#allocation7 + $0xb8] sm:$0xff] }
  0x2c   :  { %v73_v28 = vld [vmem:[#allocation7 + $0x48] sm:$0xff]  ;;  %v225_v31 = vld [vmem:[#allocation7 + $0x1c0] sm:$0xff]  ;;  %1275 = vmatprep.mubr.f32.mxu1 %v1656_v27  ;;  %v224_v35 = vld [vmem:[#allocation7 + $0x1b8] sm:$0xff] }
  0x2d   :  { %1208 = vmatpush3.xpose.msra.mxu0 %v77_v10  ;;  %v210_v29 = vld [vmem:[#allocation7 + $0x148] sm:$0xff]  ;;  %v72_v32 = vld [vmem:[#allocation7 + $0x40] sm:$0xff]  ;;  %v71_v36 = vld [vmem:[#allocation7 + $0x38] sm:$0xff] }
  0x2e   :  { %1248 = vmatpush3.xpose.msra.mxu1 %v214_v11  ;;  %1209 = vmatprep.subr.mxu0 %v92_v12  ;;  %v209_v33 = vld [vmem:[#allocation7 + $0x140] sm:$0xff]  ;;  %v208_v37 = vld [vmem:[#allocation7 + $0x138] sm:$0xff]  ;;  %v86_v38 = vld [vmem:[#allocation7 + $0xb0] sm:$0xff] }
  0x2f   :  { %1249 = vmatprep.subr.mxu1 %v229_v13  ;;  %v223_v39 = vld [vmem:[#allocation7 + $0x1b0] sm:$0xff]  ;;  %v85_v42 = vld [vmem:[#allocation7 + $0xa8] sm:$0xff]  ;;  %v84_v46 = vld [vmem:[#allocation7 + $0xa0] sm:$0xff] }
  0x30   :  { %v70_v40 = vld [vmem:[#allocation7 + $0x30] sm:$0xff]  ;;  %v222_v43 = vld [vmem:[#allocation7 + $0x1a8] sm:$0xff]  ;;  %v221_v47 = vld [vmem:[#allocation7 + $0x1a0] sm:$0xff] }
  0x31   :  { %1210 = vmatpush3.xpose.msra.mxu0 %v76_v14  ;;  %v207_v41 = vld [vmem:[#allocation7 + $0x130] sm:$0xff]  ;;  %v69_v44 = vld [vmem:[#allocation7 + $0x28] sm:$0xff]  ;;  %v68_v48 = vld [vmem:[#allocation7 + $0x20] sm:$0xff] }
  0x32   :  { %1250 = vmatpush3.xpose.msra.mxu1 %v213_v15  ;;  %1211 = vmatprep.subr.mxu0 %v91_v16  ;;  %v206_v45 = vld [vmem:[#allocation7 + $0x128] sm:$0xff]  ;;  %v205_v49 = vld [vmem:[#allocation7 + $0x120] sm:$0xff]  ;;  %v83_v50 = vld [vmem:[#allocation7 + $0x98] sm:$0xff] }
  0x33   :  { %1251 = vmatprep.subr.mxu1 %v228_v17  ;;  %v220_v51 = vld [vmem:[#allocation7 + $0x198] sm:$0xff]  ;;  %v82_v54 = vld [vmem:[#allocation7 + $0x90] sm:$0xff]  ;;  %v81_v58 = vld [vmem:[#allocation7 + $0x88] sm:$0xff] }
  0x34   :  { %v67_v52 = vld [vmem:[#allocation7 + $0x18] sm:$0xff]  ;;  %v219_v55 = vld [vmem:[#allocation7 + $0x190] sm:$0xff]  ;;  %v218_v59 = vld [vmem:[#allocation7 + $0x188] sm:$0xff] }
  0x35   :  { %1212 = vmatpush3.xpose.msra.mxu0 %v75_v18  ;;  %v204_v53 = vld [vmem:[#allocation7 + $0x118] sm:$0xff]  ;;  %v66_v56 = vld [vmem:[#allocation7 + $0x10] sm:$0xff]  ;;  %v65_v60 = vld [vmem:[#allocation7 + $0x8] sm:$0xff] }
  0x36   :  { %1252 = vmatpush3.xpose.msra.mxu1 %v212_v19  ;;  %1213 = vmatprep.subr.mxu0 %v90_v20  ;;  %v203_v57 = vld [vmem:[#allocation7 + $0x110] sm:$0xff]  ;;  %v202_v61 = vld [vmem:[#allocation7 + $0x108] sm:$0xff]  ;;  %v80_v62 = vld [vmem:[#allocation7 + $0x80] sm:$0xff] }
  0x37   :  { %1253 = vmatprep.subr.mxu1 %v227_v21  ;;  %v217_v63 = vld [vmem:[#allocation7 + $0x180] sm:$0xff]  ;;  %v377_v2 = vld [vmem:[#allocation7 + $0x2f8] sm:$0xff]  ;;  %v376_v6 = vld [vmem:[#allocation7 + $0x2f0] sm:$0xff] }
  0x38   :  { %v64_v0 = vld [vmem:[#allocation7] sm:$0xff]  ;;  %v522_v3 = vld [vmem:[#allocation7 + $0x3f8] sm:$0xff]  ;;  %v521_v7 = vld [vmem:[#allocation7 + $0x3f0] sm:$0xff] }
  0x39   :  { %1214 = vmatpush3.xpose.msra.mxu0 %v74_v22  ;;  %v201_v1 = vld [vmem:[#allocation7 + $0x100] sm:$0xff]  ;;  %v361_v4 = vld [vmem:[#allocation7 + $0x278] sm:$0xff]  ;;  %v61_v8 = vld [vmem:[#allocation6 + $0x8] sm:$0xff] }
  0x3a   :  { %1254 = vmatpush3.xpose.msra.mxu1 %v211_v23  ;;  %1215 = vmatprep.subr.mxu0 %v89_v24  ;;  %v506_v5 = vld [vmem:[#allocation7 + $0x378] sm:$0xff]  ;;  %v360_v10 = vld [vmem:[#allocation7 + $0x270] sm:$0xff]  ;;  %v375_v12 = vld [vmem:[#allocation7 + $0x2e8] sm:$0xff] }
  0x3b   :  { %1255 = vmatprep.subr.mxu1 %v226_v25  ;;  %v197_v9 = vld [vmem:[#allocation6 + $0x18] sm:$0xff]  ;;  %v505_v11 = vld [vmem:[#allocation7 + $0x370] sm:$0xff]  ;;  %v520_v13 = vld [vmem:[#allocation7 + $0x3e8] sm:$0xff] }
  0x3c   :  { %v62_v14 = vld [vmem:[#allocation6 + $0x70] sm:$0xff]  ;;  %v198_v15 = vld [vmem:[#allocation6 + $0x80] sm:$0xff]  ;;  %v359_v16 = vld [vmem:[#allocation7 + $0x268] sm:$0xff] }
  0x3d   :  { %1216 = vmatpush3.xpose.msra.mxu0 %v73_v28  ;;  %v504_v17 = vld [vmem:[#allocation7 + $0x368] sm:$0xff]  ;;  %v374_v18 = vld [vmem:[#allocation7 + $0x2e0] sm:$0xff]  ;;  %v63_v20 = vld [vmem:[#allocation6 + $0x78] sm:$0xff] }
  0x3e   :  { %1256 = vmatpush3.xpose.msra.mxu1 %v210_v29  ;;  %1217 = vmatprep.subr.mxu0 %v88_v30  ;;  %v519_v19 = vld [vmem:[#allocation7 + $0x3e0] sm:$0xff]  ;;  %v199_v21 = vld [vmem:[#allocation6 + $0x88] sm:$0xff]  ;;  %v373_v24 = vld [vmem:[#allocation7 + $0x2d8] sm:$0xff] }
  0x3f   :  { %1257 = vmatprep.subr.mxu1 %v225_v31  ;;  %v358_v22 = vld [vmem:[#allocation7 + $0x260] sm:$0xff]  ;;  %v518_v25 = vld [vmem:[#allocation7 + $0x3d8] sm:$0xff]  ;;  %v372_v30 = vld [vmem:[#allocation7 + $0x2d0] sm:$0xff] }
  0x40   :  { %v503_v23 = vld [vmem:[#allocation7 + $0x360] sm:$0xff]  ;;  %v357_v28 = vld [vmem:[#allocation7 + $0x258] sm:$0xff]  ;;  %v517_v31 = vld [vmem:[#allocation7 + $0x3d0] sm:$0xff] }
  0x41   :  { %1218 = vmatpush3.xpose.msra.mxu0 %v72_v32  ;;  %v502_v29 = vld [vmem:[#allocation7 + $0x358] sm:$0xff]  ;;  %v356_v32 = vld [vmem:[#allocation7 + $0x250] sm:$0xff] }
  0x42   :  { %1258 = vmatpush3.xpose.msra.mxu1 %v209_v33  ;;  %1219 = vmatprep.subr.mxu0 %v87_v34  ;;  %v501_v33 = vld [vmem:[#allocation7 + $0x350] sm:$0xff]  ;;  %v371_v34 = vld [vmem:[#allocation7 + $0x2c8] sm:$0xff] }
  0x43   :  { %1259 = vmatprep.subr.mxu1 %v224_v35  ;;  %v516_v35 = vld [vmem:[#allocation7 + $0x3c8] sm:$0xff] }
  0x45   :  { %1220 = vmatpush3.xpose.msra.mxu0 %v71_v36  ;;  %v355_v36 = vld [vmem:[#allocation7 + $0x248] sm:$0xff] }
  0x46   :  { %1260 = vmatpush3.xpose.msra.mxu1 %v208_v37  ;;  %1221 = vmatprep.subr.mxu0 %v86_v38  ;;  %v500_v37 = vld [vmem:[#allocation7 + $0x348] sm:$0xff]  ;;  %v370_v38 = vld [vmem:[#allocation7 + $0x2c0] sm:$0xff] }
  0x47   :  { %1261 = vmatprep.subr.mxu1 %v223_v39  ;;  %v515_v39 = vld [vmem:[#allocation7 + $0x3c0] sm:$0xff] }
  0x49   :  { %1222 = vmatpush3.xpose.msra.mxu0 %v70_v40  ;;  %v354_v40 = vld [vmem:[#allocation7 + $0x240] sm:$0xff] }
  0x4a   :  { %1262 = vmatpush3.xpose.msra.mxu1 %v207_v41  ;;  %1223 = vmatprep.subr.mxu0 %v85_v42  ;;  %v499_v41 = vld [vmem:[#allocation7 + $0x340] sm:$0xff]  ;;  %v369_v42 = vld [vmem:[#allocation7 + $0x2b8] sm:$0xff] }
  0x4b   :  { %1263 = vmatprep.subr.mxu1 %v222_v43  ;;  %v514_v43 = vld [vmem:[#allocation7 + $0x3b8] sm:$0xff] }
  0x4d   :  { %1224 = vmatpush3.xpose.msra.mxu0 %v69_v44  ;;  %v353_v44 = vld [vmem:[#allocation7 + $0x238] sm:$0xff] }
  0x4e   :  { %1264 = vmatpush3.xpose.msra.mxu1 %v206_v45  ;;  %1225 = vmatprep.subr.mxu0 %v84_v46  ;;  %v498_v45 = vld [vmem:[#allocation7 + $0x338] sm:$0xff]  ;;  %v368_v46 = vld [vmem:[#allocation7 + $0x2b0] sm:$0xff] }
  0x4f   :  { %1265 = vmatprep.subr.mxu1 %v221_v47  ;;  %v513_v47 = vld [vmem:[#allocation7 + $0x3b0] sm:$0xff] }
  0x51   :  { %1226 = vmatpush3.xpose.msra.mxu0 %v68_v48  ;;  %v352_v48 = vld [vmem:[#allocation7 + $0x230] sm:$0xff] }
  0x52   :  { %1266 = vmatpush3.xpose.msra.mxu1 %v205_v49  ;;  %1227 = vmatprep.subr.mxu0 %v83_v50  ;;  %v497_v49 = vld [vmem:[#allocation7 + $0x330] sm:$0xff]  ;;  %v367_v50 = vld [vmem:[#allocation7 + $0x2a8] sm:$0xff] }
  0x53   :  { %1267 = vmatprep.subr.mxu1 %v220_v51  ;;  %v512_v51 = vld [vmem:[#allocation7 + $0x3a8] sm:$0xff] }
  0x55   :  { %1228 = vmatpush3.xpose.msra.mxu0 %v67_v52  ;;  %v351_v52 = vld [vmem:[#allocation7 + $0x228] sm:$0xff] }
  0x56   :  { %1268 = vmatpush3.xpose.msra.mxu1 %v204_v53  ;;  %1229 = vmatprep.subr.mxu0 %v82_v54  ;;  %v496_v53 = vld [vmem:[#allocation7 + $0x328] sm:$0xff]  ;;  %v366_v54 = vld [vmem:[#allocation7 + $0x2a0] sm:$0xff] }
  0x57   :  { %1269 = vmatprep.subr.mxu1 %v219_v55  ;;  %v511_v55 = vld [vmem:[#allocation7 + $0x3a0] sm:$0xff] }
  0x59   :  { %1230 = vmatpush3.xpose.msra.mxu0 %v66_v56  ;;  %v350_v56 = vld [vmem:[#allocation7 + $0x220] sm:$0xff] }
  0x5a   :  { %1270 = vmatpush3.xpose.msra.mxu1 %v203_v57  ;;  %1231 = vmatprep.subr.mxu0 %v81_v58  ;;  %v495_v57 = vld [vmem:[#allocation7 + $0x320] sm:$0xff]  ;;  %v365_v58 = vld [vmem:[#allocation7 + $0x298] sm:$0xff] }
  0x5b   :  { %1271 = vmatprep.subr.mxu1 %v218_v59  ;;  %v510_v59 = vld [vmem:[#allocation7 + $0x398] sm:$0xff] }
  0x5d   :  { %1232 = vmatpush3.xpose.msra.mxu0 %v65_v60  ;;  %v349_v60 = vld [vmem:[#allocation7 + $0x218] sm:$0xff] }
  0x5e   :  { %1272 = vmatpush3.xpose.msra.mxu1 %v202_v61  ;;  %1233 = vmatprep.subr.mxu0 %v80_v62  ;;  %v494_v61 = vld [vmem:[#allocation7 + $0x318] sm:$0xff]  ;;  %v364_v62 = vld [vmem:[#allocation7 + $0x290] sm:$0xff] }
  0x5f   :  { %1273 = vmatprep.subr.mxu1 %v217_v63  ;;  %v509_v63 = vld [vmem:[#allocation7 + $0x390] sm:$0xff] }
  0x61   :  { %1234 = vmatpush3.xpose.msra.mxu0 %v64_v0  ;;  %v348_v0 = vld [vmem:[#allocation7 + $0x210] sm:$0xff] }
  0x62   :  { %1274 = vmatpush3.xpose.msra.mxu1 %v201_v1  ;;  %1283 = vmatprep.subr.mxu0 %v377_v2  ;;  %v493_v1 = vld [vmem:[#allocation7 + $0x310] sm:$0xff]  ;;  %v363_v2 = vld [vmem:[#allocation7 + $0x288] sm:$0xff] }
  0x63   :  { %1323 = vmatprep.subr.mxu1 %v522_v3  ;;  %v508_v3 = vld [vmem:[#allocation7 + $0x388] sm:$0xff] }
  0x64   :  { %1236 = vmatmul.mubr.f32.vlgmr.msra.gmra.mxu0 %v1654_v26  ;;  %v1662_v26 = vld [vmem:[#allocation6 + $0x20] sm:$0xff] }
  0x65   :  { %1276 = vmatmul.mubr.f32.vlgmr.msra.gmra.mxu1 %v1656_v27  ;;  %1284 = vmatpush3.xpose.msra.mxu0 %v361_v4  ;;  %v1664_v27 = vld [vmem:[#allocation6 + $0x30] sm:$0xff]  ;;  %v347_v4 = vld [vmem:[#allocation7 + $0x208] sm:$0xff] }
  0x66   :  { %1324 = vmatpush3.xpose.msra.mxu1 %v506_v5  ;;  %1285 = vmatprep.subr.mxu0 %v376_v6  ;;  %v492_v5 = vld [vmem:[#allocation7 + $0x308] sm:$0xff]  ;;  %v362_v6 = vld [vmem:[#allocation7 + $0x280] sm:$0xff] }
  0x67   :  { %1325 = vmatprep.subr.mxu1 %v521_v7  ;;  %1237 = vmatprep.mubr.f32.mxu0 %v61_v8  ;;  %v507_v7 = vld [vmem:[#allocation7 + $0x380] sm:$0xff] }
  0x68   :  { %1277 = vmatprep.mubr.f32.mxu1 %v197_v9  ;;  %1238 = vmatmul.mubr.f32.gmra.mxu0 %v61_v8  ;;  %v346_v8 = vld [vmem:[#allocation7 + $0x200] sm:$0xff] }
  0x69   :  { %1278 = vmatmul.mubr.f32.gmra.mxu1 %v197_v9  ;;  %1286 = vmatpush3.xpose.msra.mxu0 %v360_v10  ;;  %v491_v9 = vld [vmem:[#allocation7 + $0x300] sm:$0xff]  ;;  %v667_v10 = vld [vmem:[#allocation7 + $0x4f8] sm:$0xff] }
  0x6a   :  { %1326 = vmatpush3.xpose.msra.mxu1 %v505_v11  ;;  %1287 = vmatprep.subr.mxu0 %v375_v12  ;;  %v812_v11 = vld [vmem:[#allocation7 + $0x5f8] sm:$0xff] }
  0x6b   :  { %1327 = vmatprep.subr.mxu1 %v520_v13  ;;  %1239 = vmatprep.mubr.f32.mxu0 %v62_v14  ;;  %v651_v12 = vld [vmem:[#allocation7 + $0x478] sm:$0xff] }
  0x6c   :  { %1279 = vmatprep.mubr.f32.mxu1 %v198_v15  ;;  %1240 = vmatmul.mubr.f32.gmra.mxu0 %v62_v14  ;;  %v796_v13 = vld [vmem:[#allocation7 + $0x578] sm:$0xff]  ;;  %v342_v14 = vld [vmem:[#allocation6 + $0x28] sm:$0xff] }
  0x6d   :  { %1280 = vmatmul.mubr.f32.gmra.mxu1 %v198_v15  ;;  %1288 = vmatpush3.xpose.msra.mxu0 %v359_v16  ;;  %v666_v15 = vld [vmem:[#allocation7 + $0x4f0] sm:$0xff] }
  0x6e   :  { %1328 = vmatpush3.xpose.msra.mxu1 %v504_v17  ;;  %1289 = vmatprep.subr.mxu0 %v374_v18  ;;  %v811_v16 = vld [vmem:[#allocation7 + $0x5f0] sm:$0xff]  ;;  %v487_v17 = vld [vmem:[#allocation6 + $0x38] sm:$0xff] }
  0x6f   :  { %1329 = vmatprep.subr.mxu1 %v519_v19  ;;  %1241 = vmatprep.mubr.f32.mxu0 %v63_v20  ;;  %v650_v18 = vld [vmem:[#allocation7 + $0x470] sm:$0xff] }
  0x70   :  { %1281 = vmatprep.mubr.f32.mxu1 %v199_v21  ;;  %1242 = vmatmul.mubr.f32.gmra.mxu0 %v63_v20  ;;  %v795_v19 = vld [vmem:[#allocation7 + $0x570] sm:$0xff] }
  0x71   :  { %1282 = vmatmul.mubr.f32.gmra.mxu1 %v199_v21  ;;  %1290 = vmatpush3.xpose.msra.mxu0 %v358_v22  ;;  %v343_v20 = vld [vmem:[#allocation6 + $0x90] sm:$0xff]  ;;  %v665_v21 = vld [vmem:[#allocation7 + $0x4e8] sm:$0xff] }
  0x72   :  { %1330 = vmatpush3.xpose.msra.mxu1 %v503_v23  ;;  %1291 = vmatprep.subr.mxu0 %v373_v24  ;;  %v810_v22 = vld [vmem:[#allocation7 + $0x5e8] sm:$0xff]  ;;  %v488_v23 = vld [vmem:[#allocation6 + $0xa0] sm:$0xff] }
  0x73   :  { %1331 = vmatprep.subr.mxu1 %v518_v25  ;;  %1315 = vmatprep.mubr.f32.mxu0 %v1662_v26  ;;  %v649_v24 = vld [vmem:[#allocation7 + $0x468] sm:$0xff] }
  0x74   :  { %1355 = vmatprep.mubr.f32.mxu1 %v1664_v27  ;;  %v794_v25 = vld [vmem:[#allocation7 + $0x568] sm:$0xff] }
  0x75   :  { %1292 = vmatpush3.xpose.msra.mxu0 %v357_v28  ;;  %v809_v28 = vld [vmem:[#allocation7 + $0x5e0] sm:$0xff] }
  0x76   :  { %1332 = vmatpush3.xpose.msra.mxu1 %v502_v29  ;;  %1293 = vmatprep.subr.mxu0 %v372_v30  ;;  %v489_v29 = vld [vmem:[#allocation6 + $0xa8] sm:$0xff]  ;;  %v648_v30 = vld [vmem:[#allocation7 + $0x460] sm:$0xff] }
  0x77   :  { %1333 = vmatprep.subr.mxu1 %v517_v31  ;;  %v793_v31 = vld [vmem:[#allocation7 + $0x560] sm:$0xff] }
  0x79   :  { %1294 = vmatpush3.xpose.msra.mxu0 %v356_v32  ;;  %v663_v32 = vld [vmem:[#allocation7 + $0x4d8] sm:$0xff] }
  0x7a   :  { %1334 = vmatpush3.xpose.msra.mxu1 %v501_v33  ;;  %1295 = vmatprep.subr.mxu0 %v371_v34  ;;  %v808_v33 = vld [vmem:[#allocation7 + $0x5d8] sm:$0xff]  ;;  %v1670_v34 = vld [vmem:[#allocation6 + $0x40] sm:$0xff] }
  0x7b   :  { %1335 = vmatprep.subr.mxu1 %v516_v35  ;;  %v1672_v35 = vld [vmem:[#allocation6 + $0x50] sm:$0xff] }
  0x7d   :  { %1296 = vmatpush3.xpose.msra.mxu0 %v355_v36  ;;  %v647_v36 = vld [vmem:[#allocation7 + $0x458] sm:$0xff] }
  0x7e   :  { %1336 = vmatpush3.xpose.msra.mxu1 %v500_v37  ;;  %1297 = vmatprep.subr.mxu0 %v370_v38  ;;  %v792_v37 = vld [vmem:[#allocation7 + $0x558] sm:$0xff]  ;;  %v662_v38 = vld [vmem:[#allocation7 + $0x4d0] sm:$0xff] }
  0x7f   :  { %1337 = vmatprep.subr.mxu1 %v515_v39  ;;  %v807_v39 = vld [vmem:[#allocation7 + $0x5d0] sm:$0xff] }
  0x81   :  { %1298 = vmatpush3.xpose.msra.mxu0 %v354_v40  ;;  %v646_v40 = vld [vmem:[#allocation7 + $0x450] sm:$0xff] }
  0x82   :  { %1338 = vmatpush3.xpose.msra.mxu1 %v499_v41  ;;  %1299 = vmatprep.subr.mxu0 %v369_v42  ;;  %v791_v41 = vld [vmem:[#allocation7 + $0x550] sm:$0xff]  ;;  %v661_v42 = vld [vmem:[#allocation7 + $0x4c8] sm:$0xff] }
  0x83   :  { %1339 = vmatprep.subr.mxu1 %v514_v43  ;;  %v806_v43 = vld [vmem:[#allocation7 + $0x5c8] sm:$0xff] }
  0x85   :  { %1300 = vmatpush3.xpose.msra.mxu0 %v353_v44  ;;  %v645_v44 = vld [vmem:[#allocation7 + $0x448] sm:$0xff] }
  0x86   :  { %1340 = vmatpush3.xpose.msra.mxu1 %v498_v45  ;;  %1301 = vmatprep.subr.mxu0 %v368_v46  ;;  %v790_v45 = vld [vmem:[#allocation7 + $0x548] sm:$0xff]  ;;  %v660_v46 = vld [vmem:[#allocation7 + $0x4c0] sm:$0xff] }
  0x87   :  { %1341 = vmatprep.subr.mxu1 %v513_v47  ;;  %v805_v47 = vld [vmem:[#allocation7 + $0x5c0] sm:$0xff] }
  0x89   :  { %1302 = vmatpush3.xpose.msra.mxu0 %v352_v48  ;;  %v644_v48 = vld [vmem:[#allocation7 + $0x440] sm:$0xff] }
  0x8a   :  { %1342 = vmatpush3.xpose.msra.mxu1 %v497_v49  ;;  %1303 = vmatprep.subr.mxu0 %v367_v50  ;;  %v789_v49 = vld [vmem:[#allocation7 + $0x540] sm:$0xff]  ;;  %v659_v50 = vld [vmem:[#allocation7 + $0x4b8] sm:$0xff] }
  0x8b   :  { %1343 = vmatprep.subr.mxu1 %v512_v51  ;;  %v804_v51 = vld [vmem:[#allocation7 + $0x5b8] sm:$0xff] }
  0x8d   :  { %1304 = vmatpush3.xpose.msra.mxu0 %v351_v52  ;;  %v643_v52 = vld [vmem:[#allocation7 + $0x438] sm:$0xff] }
  0x8e   :  { %1344 = vmatpush3.xpose.msra.mxu1 %v496_v53  ;;  %1305 = vmatprep.subr.mxu0 %v366_v54  ;;  %v788_v53 = vld [vmem:[#allocation7 + $0x538] sm:$0xff]  ;;  %v658_v54 = vld [vmem:[#allocation7 + $0x4b0] sm:$0xff] }
  0x8f   :  { %1345 = vmatprep.subr.mxu1 %v511_v55  ;;  %v803_v55 = vld [vmem:[#allocation7 + $0x5b0] sm:$0xff] }
  0x91   :  { %1306 = vmatpush3.xpose.msra.mxu0 %v350_v56  ;;  %v642_v56 = vld [vmem:[#allocation7 + $0x430] sm:$0xff] }
  0x92   :  { %1346 = vmatpush3.xpose.msra.mxu1 %v495_v57  ;;  %1307 = vmatprep.subr.mxu0 %v365_v58  ;;  %v787_v57 = vld [vmem:[#allocation7 + $0x530] sm:$0xff]  ;;  %v657_v58 = vld [vmem:[#allocation7 + $0x4a8] sm:$0xff] }
  0x93   :  { %1347 = vmatprep.subr.mxu1 %v510_v59  ;;  %v802_v59 = vld [vmem:[#allocation7 + $0x5a8] sm:$0xff] }
  0x95   :  { %1308 = vmatpush3.xpose.msra.mxu0 %v349_v60  ;;  %v641_v60 = vld [vmem:[#allocation7 + $0x428] sm:$0xff] }
  0x96   :  { %1348 = vmatpush3.xpose.msra.mxu1 %v494_v61  ;;  %1309 = vmatprep.subr.mxu0 %v364_v62  ;;  %v786_v61 = vld [vmem:[#allocation7 + $0x528] sm:$0xff]  ;;  %v656_v62 = vld [vmem:[#allocation7 + $0x4a0] sm:$0xff] }
  0x97   :  { %1349 = vmatprep.subr.mxu1 %v509_v63  ;;  %v801_v63 = vld [vmem:[#allocation7 + $0x5a0] sm:$0xff] }
  0x99   :  { %1310 = vmatpush3.xpose.msra.mxu0 %v348_v0  ;;  %v640_v0 = vld [vmem:[#allocation7 + $0x420] sm:$0xff] }
  0x9a   :  { %1350 = vmatpush3.xpose.msra.mxu1 %v493_v1  ;;  %1311 = vmatprep.subr.mxu0 %v363_v2  ;;  %v785_v1 = vld [vmem:[#allocation7 + $0x520] sm:$0xff]  ;;  %v655_v2 = vld [vmem:[#allocation7 + $0x498] sm:$0xff] }
  0x9b   :  { %1351 = vmatprep.subr.mxu1 %v508_v3  ;;  %v800_v3 = vld [vmem:[#allocation7 + $0x598] sm:$0xff] }
  0x9d   :  { %1312 = vmatpush3.xpose.msra.mxu0 %v347_v4  ;;  %v639_v4 = vld [vmem:[#allocation7 + $0x418] sm:$0xff] }
  0x9e   :  { %1352 = vmatpush3.xpose.msra.mxu1 %v492_v5  ;;  %1313 = vmatprep.subr.mxu0 %v362_v6  ;;  %v784_v5 = vld [vmem:[#allocation7 + $0x518] sm:$0xff]  ;;  %v654_v6 = vld [vmem:[#allocation7 + $0x490] sm:$0xff] }
  0x9f   :  { %1353 = vmatprep.subr.mxu1 %v507_v7  ;;  %v799_v7 = vld [vmem:[#allocation7 + $0x590] sm:$0xff] }
  0xa1   :  { %1314 = vmatpush3.xpose.msra.mxu0 %v346_v8  ;;  %v638_v8 = vld [vmem:[#allocation7 + $0x410] sm:$0xff] }
  0xa2   :  { %1354 = vmatpush3.xpose.msra.mxu1 %v491_v9  ;;  %1363 = vmatprep.subr.mxu0 %v667_v10  ;;  %v783_v9 = vld [vmem:[#allocation7 + $0x510] sm:$0xff]  ;;  %v653_v10 = vld [vmem:[#allocation7 + $0x488] sm:$0xff] }
  0xa3   :  { %1403 = vmatprep.subr.mxu1 %v812_v11  ;;  %v798_v11 = vld [vmem:[#allocation7 + $0x588] sm:$0xff] }
  0xa4   :  { %1316 = vmatmul.mubr.f32.vlgmr.msra.gmra.mxu0 %v1662_v26  ;;  %v344_v26 = vld [vmem:[#allocation6 + $0x98] sm:$0xff] }
  0xa5   :  { %1356 = vmatmul.mubr.f32.vlgmr.msra.gmra.mxu1 %v1664_v27  ;;  %1364 = vmatpush3.xpose.msra.mxu0 %v651_v12  ;;  %v664_v27 = vld [vmem:[#allocation7 + $0x4e0] sm:$0xff]  ;;  %v637_v12 = vld [vmem:[#allocation7 + $0x408] sm:$0xff] }
  0xa6   :  { %1404 = vmatpush3.xpose.msra.mxu1 %v796_v13  ;;  %1317 = vmatprep.mubr.f32.mxu0 %v342_v14  ;;  %v782_v13 = vld [vmem:[#allocation7 + $0x508] sm:$0xff] }
  0xa7   :  { %1365 = vmatprep.subr.mxu0 %v666_v15  ;;  %1405 = vmatprep.subr.mxu1 %v811_v16  ;;  %v797_v15 = vld [vmem:[#allocation7 + $0x580] sm:$0xff] }
  0xa8   :  { %1357 = vmatprep.mubr.f32.mxu1 %v487_v17  ;;  %1318 = vmatmul.mubr.f32.gmra.mxu0 %v342_v14  ;;  %v652_v14 = vld [vmem:[#allocation7 + $0x480] sm:$0xff] }
  0xa9   :  { %1358 = vmatmul.mubr.f32.gmra.mxu1 %v487_v17  ;;  %1366 = vmatpush3.xpose.msra.mxu0 %v650_v18  ;;  %v636_v16 = vld [vmem:[#allocation7 + $0x400] sm:$0xff]  ;;  %v957_v18 = vld [vmem:[#allocation7 + $0x6f8] sm:$0xff] }
  0xaa   :  { %1406 = vmatpush3.xpose.msra.mxu1 %v795_v19  ;;  %1319 = vmatprep.mubr.f32.mxu0 %v343_v20  ;;  %v781_v17 = vld [vmem:[#allocation7 + $0x500] sm:$0xff]  ;;  %v941_v19 = vld [vmem:[#allocation7 + $0x678] sm:$0xff] }
  0xab   :  { %1367 = vmatprep.subr.mxu0 %v665_v21  ;;  %1407 = vmatprep.subr.mxu1 %v810_v22  ;;  %v956_v21 = vld [vmem:[#allocation7 + $0x6f0] sm:$0xff]  ;;  %v777_v22 = vld [vmem:[#allocation6 + $0x58] sm:$0xff] }
  0xac   :  { %1359 = vmatprep.mubr.f32.mxu1 %v488_v23  ;;  %1320 = vmatmul.mubr.f32.gmra.mxu0 %v343_v20  ;;  %v632_v20 = vld [vmem:[#allocation6 + $0x48] sm:$0xff] }
  0xad   :  { %1360 = vmatmul.mubr.f32.gmra.mxu1 %v488_v23  ;;  %1368 = vmatpush3.xpose.msra.mxu0 %v649_v24  ;;  %v940_v23 = vld [vmem:[#allocation7 + $0x670] sm:$0xff] }
  0xae   :  { %1408 = vmatpush3.xpose.msra.mxu1 %v794_v25  ;;  %1321 = vmatprep.mubr.f32.mxu0 %v344_v26  ;;  %v633_v24 = vld [vmem:[#allocation6 + $0xb0] sm:$0xff]  ;;  %v955_v25 = vld [vmem:[#allocation7 + $0x6e8] sm:$0xff] }
  0xaf   :  { %1369 = vmatprep.subr.mxu0 %v664_v27  ;;  %1409 = vmatprep.subr.mxu1 %v809_v28  ;;  %v939_v27 = vld [vmem:[#allocation7 + $0x668] sm:$0xff]  ;;  %v634_v28 = vld [vmem:[#allocation6 + $0xb8] sm:$0xff] }
  0xb0   :  { %1361 = vmatprep.mubr.f32.mxu1 %v489_v29  ;;  %1322 = vmatmul.mubr.f32.gmra.mxu0 %v344_v26  ;;  %v778_v26 = vld [vmem:[#allocation6 + $0xc0] sm:$0xff] }
  0xb1   :  { %1362 = vmatmul.mubr.f32.gmra.mxu1 %v489_v29  ;;  %1370 = vmatpush3.xpose.msra.mxu0 %v648_v30  ;;  %v954_v29 = vld [vmem:[#allocation7 + $0x6e0] sm:$0xff]  ;;  %v779_v30 = vld [vmem:[#allocation6 + $0xc8] sm:$0xff] }
  0xb2   :  { %1410 = vmatpush3.xpose.msra.mxu1 %v793_v31  ;;  %1371 = vmatprep.subr.mxu0 %v663_v32  ;;  %v938_v31 = vld [vmem:[#allocation7 + $0x660] sm:$0xff]  ;;  %v953_v32 = vld [vmem:[#allocation7 + $0x6d8] sm:$0xff] }
  0xb3   :  { %1411 = vmatprep.subr.mxu1 %v808_v33  ;;  %1395 = vmatprep.mubr.f32.mxu0 %v1670_v34  ;;  %v1678_v33 = vld [vmem:[#allocation6 + $0x60] sm:$0xff] }
  0xb4   :  { %1435 = vmatprep.mubr.f32.mxu1 %v1672_v35 }
  0xb5   :  { %1372 = vmatpush3.xpose.msra.mxu0 %v647_v36  ;;  %v952_v36 = vld [vmem:[#allocation7 + $0x6d0] sm:$0xff] }
  0xb6   :  { %1412 = vmatpush3.xpose.msra.mxu1 %v792_v37  ;;  %1373 = vmatprep.subr.mxu0 %v662_v38  ;;  %v936_v37 = vld [vmem:[#allocation7 + $0x650] sm:$0xff]  ;;  %v951_v38 = vld [vmem:[#allocation7 + $0x6c8] sm:$0xff] }
  0xb7   :  { %1413 = vmatprep.subr.mxu1 %v807_v39  ;;  %v935_v39 = vld [vmem:[#allocation7 + $0x648] sm:$0xff] }
  0xb9   :  { %1374 = vmatpush3.xpose.msra.mxu0 %v646_v40  ;;  %v950_v40 = vld [vmem:[#allocation7 + $0x6c0] sm:$0xff] }
  0xba   :  { %1414 = vmatpush3.xpose.msra.mxu1 %v791_v41  ;;  %1375 = vmatprep.subr.mxu0 %v661_v42  ;;  %v934_v41 = vld [vmem:[#allocation7 + $0x640] sm:$0xff]  ;;  %v949_v42 = vld [vmem:[#allocation7 + $0x6b8] sm:$0xff] }
  0xbb   :  { %1415 = vmatprep.subr.mxu1 %v806_v43  ;;  %v933_v43 = vld [vmem:[#allocation7 + $0x638] sm:$0xff] }
  0xbd   :  { %1376 = vmatpush3.xpose.msra.mxu0 %v645_v44  ;;  %v948_v44 = vld [vmem:[#allocation7 + $0x6b0] sm:$0xff] }
  0xbe   :  { %1416 = vmatpush3.xpose.msra.mxu1 %v790_v45  ;;  %1377 = vmatprep.subr.mxu0 %v660_v46  ;;  %v932_v45 = vld [vmem:[#allocation7 + $0x630] sm:$0xff]  ;;  %v947_v46 = vld [vmem:[#allocation7 + $0x6a8] sm:$0xff] }
  0xbf   :  { %1417 = vmatprep.subr.mxu1 %v805_v47  ;;  %v931_v47 = vld [vmem:[#allocation7 + $0x628] sm:$0xff] }
  0xc1   :  { %1378 = vmatpush3.xpose.msra.mxu0 %v644_v48  ;;  %v946_v48 = vld [vmem:[#allocation7 + $0x6a0] sm:$0xff] }
  0xc2   :  { %1418 = vmatpush3.xpose.msra.mxu1 %v789_v49  ;;  %1379 = vmatprep.subr.mxu0 %v659_v50  ;;  %v930_v49 = vld [vmem:[#allocation7 + $0x620] sm:$0xff]  ;;  %v945_v50 = vld [vmem:[#allocation7 + $0x698] sm:$0xff] }
  0xc3   :  { %1419 = vmatprep.subr.mxu1 %v804_v51  ;;  %v929_v51 = vld [vmem:[#allocation7 + $0x618] sm:$0xff] }
  0xc5   :  { %1380 = vmatpush3.xpose.msra.mxu0 %v643_v52  ;;  %v944_v52 = vld [vmem:[#allocation7 + $0x690] sm:$0xff] }
  0xc6   :  { %1420 = vmatpush3.xpose.msra.mxu1 %v788_v53  ;;  %1381 = vmatprep.subr.mxu0 %v658_v54  ;;  %v928_v53 = vld [vmem:[#allocation7 + $0x610] sm:$0xff]  ;;  %v943_v54 = vld [vmem:[#allocation7 + $0x688] sm:$0xff] }
  0xc7   :  { %1421 = vmatprep.subr.mxu1 %v803_v55  ;;  %v927_v55 = vld [vmem:[#allocation7 + $0x608] sm:$0xff] }
  0xc9   :  { %1382 = vmatpush3.xpose.msra.mxu0 %v642_v56  ;;  %v942_v56 = vld [vmem:[#allocation7 + $0x680] sm:$0xff] }
  0xca   :  { %1422 = vmatpush3.xpose.msra.mxu1 %v787_v57  ;;  %1383 = vmatprep.subr.mxu0 %v657_v58  ;;  %v926_v57 = vld [vmem:[#allocation7 + $0x600] sm:$0xff]  ;;  %v922_v58 = vld [vmem:[#allocation6 + $0x68] sm:$0xff] }
  0xcb   :  { %1423 = vmatprep.subr.mxu1 %v802_v59  ;;  %v924_v59 = vld [vmem:[#allocation6 + $0xd8] sm:$0xff] }
  0xcd   :  { %1384 = vmatpush3.xpose.msra.mxu0 %v641_v60 }
  0xce   :  { %1424 = vmatpush3.xpose.msra.mxu1 %v786_v61  ;;  %1385 = vmatprep.subr.mxu0 %v656_v62 }
  0xcf   :  { %1425 = vmatprep.subr.mxu1 %v801_v63 }
  0xd1   :  { %1386 = vmatpush3.xpose.msra.mxu0 %v640_v0 }
  0xd2   :  { %1426 = vmatpush3.xpose.msra.mxu1 %v785_v1  ;;  %1387 = vmatprep.subr.mxu0 %v655_v2 }
  0xd3   :  { %1427 = vmatprep.subr.mxu1 %v800_v3 }
  0xd5   :  { %1388 = vmatpush3.xpose.msra.mxu0 %v639_v4 }
  0xd6   :  { %1428 = vmatpush3.xpose.msra.mxu1 %v784_v5  ;;  %1389 = vmatprep.subr.mxu0 %v654_v6 }
  0xd7   :  { %1429 = vmatprep.subr.mxu1 %v799_v7 }
  0xd9   :  { %1390 = vmatpush3.xpose.msra.mxu0 %v638_v8 }
  0xda   :  { %1430 = vmatpush3.xpose.msra.mxu1 %v783_v9  ;;  %1391 = vmatprep.subr.mxu0 %v653_v10 }
  0xdb   :  { %1431 = vmatprep.subr.mxu1 %v798_v11 }
  0xdd   :  { %1392 = vmatpush3.xpose.msra.mxu0 %v637_v12 }
  0xde   :  { %1432 = vmatpush3.xpose.msra.mxu1 %v782_v13  ;;  %1393 = vmatprep.subr.mxu0 %v652_v14 }
  0xdf   :  { %1433 = vmatprep.subr.mxu1 %v797_v15 }
  0xe1   :  { %1394 = vmatpush3.xpose.msra.mxu0 %v636_v16 }
  0xe2   :  { %1434 = vmatpush3.xpose.msra.mxu1 %v781_v17  ;;  %1443 = vmatprep.subr.mxu0 %v957_v18 }
  0xe3   :  { %1483 = vmatprep.subr.mxu1 %v957_v18 }
  0xe4   :  { %1396 = vmatmul.mubr.f32.vlgmr.msra.gmra.mxu0 %v1670_v34  ;;  %v1680_v34 = vld [vmem:[#allocation6 + $0xd0] sm:$0xff] }
  0xe5   :  { %1436 = vmatmul.mubr.f32.vlgmr.msra.gmra.mxu1 %v1672_v35  ;;  %1444 = vmatpush3.xpose.msra.mxu0 %v941_v19  ;;  %v937_v35 = vld [vmem:[#allocation7 + $0x658] sm:$0xff] }
  0xe6   :  { %1499 = vmatpush3.xpose.msra.mxu1 %v941_v19  ;;  %1397 = vmatprep.mubr.f32.mxu0 %v632_v20 }
  0xe7   :  { %1445 = vmatprep.subr.mxu0 %v956_v21  ;;  %1484 = vmatprep.subr.mxu1 %v956_v21 }
  0xe8   :  { %1437 = vmatprep.mubr.f32.mxu1 %v777_v22  ;;  %1398 = vmatmul.mubr.f32.gmra.mxu0 %v632_v20 }
  0xe9   :  { %1438 = vmatmul.mubr.f32.gmra.mxu1 %v777_v22  ;;  %1446 = vmatpush3.xpose.msra.mxu0 %v940_v23 }
  0xea   :  { %1500 = vmatpush3.xpose.msra.mxu1 %v940_v23  ;;  %1399 = vmatprep.mubr.f32.mxu0 %v633_v24 }
  0xeb   :  { %1447 = vmatprep.subr.mxu0 %v955_v25  ;;  %1485 = vmatprep.subr.mxu1 %v955_v25 }
  0xec   :  { %1439 = vmatprep.mubr.f32.mxu1 %v778_v26  ;;  %1400 = vmatmul.mubr.f32.gmra.mxu0 %v633_v24 }
  0xed   :  { %1440 = vmatmul.mubr.f32.gmra.mxu1 %v778_v26  ;;  %1448 = vmatpush3.xpose.msra.mxu0 %v939_v27 }
  0xee   :  { %1501 = vmatpush3.xpose.msra.mxu1 %v939_v27  ;;  %1401 = vmatprep.mubr.f32.mxu0 %v634_v28 }
  0xef   :  { %1449 = vmatprep.subr.mxu0 %v954_v29  ;;  %1486 = vmatprep.subr.mxu1 %v954_v29 }
  0xf0   :  { %1441 = vmatprep.mubr.f32.mxu1 %v779_v30  ;;  %1402 = vmatmul.mubr.f32.gmra.mxu0 %v634_v28 }
  0xf1   :  { %1442 = vmatmul.mubr.f32.gmra.mxu1 %v779_v30  ;;  %1450 = vmatpush3.xpose.msra.mxu0 %v938_v31 }
  0xf2   :  { %1502 = vmatpush3.xpose.msra.mxu1 %v938_v31  ;;  %1451 = vmatprep.subr.mxu0 %v953_v32 }
  0xf3   :  { %1487 = vmatprep.subr.mxu1 %v953_v32  ;;  %1475 = vmatprep.mubr.f32.mxu0 %v1678_v33 }
  0xf4   :  { %1479 = vmatprep.mubr.f32.mxu1 %v1680_v34 }
  0xf5   :  { %1452 = vmatpush3.xpose.msra.mxu0 %v937_v35 }
  0xf6   :  { %1503 = vmatpush3.xpose.msra.mxu1 %v937_v35  ;;  %1453 = vmatprep.subr.mxu0 %v952_v36  ;;  %v323_v35 = vstv %s1197_s2 }
  0xf7   :  { %1488 = vmatprep.subr.mxu1 %v952_v36 }
  0xf9   :  { %1454 = vmatpush3.xpose.msra.mxu0 %v936_v37 }
  0xfa   :  { %1504 = vmatpush3.xpose.msra.mxu1 %v936_v37  ;;  %1455 = vmatprep.subr.mxu0 %v951_v38  ;;  %v468_v37 = vstv %s1198_s7 }
  0xfb   :  { %1489 = vmatprep.subr.mxu1 %v951_v38  ;;  %v1718_v38 = vstv %s1199_s8 }
  0xfd   :  { %1456 = vmatpush3.xpose.msra.mxu0 %v935_v39 }
  0xfe   :  { %1505 = vmatpush3.xpose.msra.mxu1 %v935_v39  ;;  %1457 = vmatprep.subr.mxu0 %v950_v40  ;;  %v1720_v39 = vstv %s1200_s9 }
  0xff   :  { %1490 = vmatprep.subr.mxu1 %v950_v40 }
 0x101   :  { %1458 = vmatpush3.xpose.msra.mxu0 %v934_v41 }
 0x102   :  { %1506 = vmatpush3.xpose.msra.mxu1 %v934_v41  ;;  %1459 = vmatprep.subr.mxu0 %v949_v42 }
 0x103   :  { %1491 = vmatprep.subr.mxu1 %v949_v42 }
 0x105   :  { %1460 = vmatpush3.xpose.msra.mxu0 %v933_v43 }
 0x106   :  { %1507 = vmatpush3.xpose.msra.mxu1 %v933_v43  ;;  %1461 = vmatprep.subr.mxu0 %v948_v44 }
 0x107   :  { %1492 = vmatprep.subr.mxu1 %v948_v44 }
 0x109   :  { %1462 = vmatpush3.xpose.msra.mxu0 %v932_v45 }
 0x10a   :  { %1508 = vmatpush3.xpose.msra.mxu1 %v932_v45  ;;  %1463 = vmatprep.subr.mxu0 %v947_v46 }
 0x10b   :  { %1493 = vmatprep.subr.mxu1 %v947_v46 }
 0x10d   :  { %1464 = vmatpush3.xpose.msra.mxu0 %v931_v47 }
 0x10e   :  { %1509 = vmatpush3.xpose.msra.mxu1 %v931_v47  ;;  %1465 = vmatprep.subr.mxu0 %v946_v48 }
 0x10f   :  { %1494 = vmatprep.subr.mxu1 %v946_v48 }
 0x111   :  { %1466 = vmatpush3.xpose.msra.mxu0 %v930_v49 }
 0x112   :  { %1510 = vmatpush3.xpose.msra.mxu1 %v930_v49  ;;  %1467 = vmatprep.subr.mxu0 %v945_v50 }
 0x113   :  { %1495 = vmatprep.subr.mxu1 %v945_v50 }
 0x115   :  { %1468 = vmatpush3.xpose.msra.mxu0 %v929_v51 }
 0x116   :  { %1511 = vmatpush3.xpose.msra.mxu1 %v929_v51  ;;  %1469 = vmatprep.subr.mxu0 %v944_v52 }
 0x117   :  { %1496 = vmatprep.subr.mxu1 %v944_v52 }
 0x119   :  { %1470 = vmatpush3.xpose.msra.mxu0 %v928_v53 }
 0x11a   :  { %1512 = vmatpush3.xpose.msra.mxu1 %v928_v53  ;;  %1471 = vmatprep.subr.mxu0 %v943_v54 }
 0x11b   :  { %1497 = vmatprep.subr.mxu1 %v943_v54 }
 0x11d   :  { %1472 = vmatpush3.xpose.msra.mxu0 %v927_v55 }
 0x11e   :  { %1513 = vmatpush3.xpose.msra.mxu1 %v927_v55  ;;  %1473 = vmatprep.subr.mxu0 %v942_v56 }
 0x11f   :  { %1498 = vmatprep.subr.mxu1 %v942_v56 }
 0x121   :  { %1474 = vmatpush3.xpose.msra.mxu0 %v926_v57 }
 0x122   :  { %1514 = vmatpush3.xpose.msra.mxu1 %v926_v57  ;;  %v1726_v57 = vstv %s1201_s10 }
 0x124   :  { %1476 = vmatmul.mubr.f32.vlgmr.msra.gmra.mxu0 %v1678_v33  ;;  %v162_v60 = vpop.f32.mrf.mxu0 }
 0x125   :  { %1480 = vmatmul.mubr.f32.vlgmr.msra.gmra.mxu1 %v1680_v34  ;;  %1477 = vmatprep.mubr.f32.mxu0 %v922_v58  ;;  %v299_v61 = vpop.f32.mrf.mxu1  ;;  %v186_v34 = vstv %s185_s1 }
 0x126   :  { %1481 = vmatprep.mubr.f32.mxu1 %v924_v59  ;;  %v164_v62 = vpop.f32.mrf.mxu0  ;;  %v187_v40 = vmul.f32 %v186_v34, %v162_v60  ;;  %v324_v41 = vmul.f32 %v323_v35, %v299_v61 }
 0x127   :  { %v301_v0 = vpop.f32.mrf.mxu1  ;;  %v188_v42 = vmul.f32 %v186_v34, %v164_v62 }
 0x128   :  { %1478 = vmatmul.mubr.f32.gmra.mxu0 %v922_v58  ;;  %v168_v63 = vpop.f32.mrf.mxu0  ;;  %v325_v43 = vmul.f32 %v323_v35, %v301_v0  ;;  %v332_v58 = vadd.f32 %v324_v41, %v187_v40 }
 0x129   :  { %1482 = vmatmul.mubr.f32.gmra.mxu1 %v924_v59  ;;  %v305_v1 = vpop.f32.mrf.mxu1  ;;  %v189_v45 = vmul.f32 %v186_v34, %v168_v63 }
 0x12a   :  { %v170_v2 = vpop.f32.mrf.mxu0  ;;  %v326_v46 = vmul.f32 %v323_v35, %v305_v1  ;;  %v333_v63 = vadd.f32 %v325_v43, %v188_v42 }
 0x12b   :  { %v307_v3 = vpop.f32.mrf.mxu1  ;;  %v190_v47 = vmul.f32 %v186_v34, %v170_v2 }
 0x12c   :  { %v174_v4 = vpop.f32.mrf.mxu0  ;;  %v327_v48 = vmul.f32 %v323_v35, %v307_v3  ;;  %v334_v0 = vadd.f32 %v326_v46, %v189_v45 }
 0x12d   :  { %v311_v5 = vpop.f32.mrf.mxu1  ;;  %v191_v49 = vmul.f32 %v186_v34, %v174_v4 }
 0x12e   :  { %v176_v6 = vpop.f32.mrf.mxu0  ;;  %v328_v50 = vmul.f32 %v323_v35, %v311_v5  ;;  %v335_v1 = vadd.f32 %v327_v48, %v190_v47 }
 0x12f   :  { %v313_v7 = vpop.f32.mrf.mxu1  ;;  %v192_v51 = vmul.f32 %v186_v34, %v176_v6 }
 0x130   :  { %v180_v8 = vpop.f32.mrf.mxu0  ;;  %v329_v52 = vmul.f32 %v323_v35, %v313_v7  ;;  %v336_v3 = vadd.f32 %v328_v50, %v191_v49 }
 0x131   :  { %v317_v9 = vpop.f32.mrf.mxu1  ;;  %v193_v54 = vmul.f32 %v186_v34, %v180_v8 }
 0x132   :  { %v182_v10 = vpop.f32.mrf.mxu0  ;;  %v330_v55 = vmul.f32 %v323_v35, %v317_v9  ;;  %v337_v4 = vadd.f32 %v329_v52, %v192_v51 }
 0x133   :  { %v319_v11 = vpop.f32.mrf.mxu1  ;;  %v194_v59 = vmul.f32 %v186_v34, %v182_v10 }
 0x134   :  { %v331_v60 = vmul.f32 %v323_v35, %v319_v11  ;;  %v338_v8 = vadd.f32 %v330_v55, %v193_v54 }
 0x136   :  { %v339_v10 = vadd.f32 %v331_v60, %v194_v59 }
 0x164   :  { %v444_v12 = vpop.f32.mrf.mxu0 }
 0x165   :  { %v1686_v13 = vpop.f32.mrf.mxu1  ;;  %v469_v56 = vmul.f32 %v468_v37, %v444_v12 }
 0x166   :  { %v446_v14 = vpop.f32.mrf.mxu0  ;;  %v614_v12 = vmul.f32 %v1718_v38, %v1686_v13 }
 0x167   :  { %v1688_v15 = vpop.f32.mrf.mxu1  ;;  %v470_v61 = vmul.f32 %v468_v37, %v446_v14  ;;  %v477_v9 = vadd.f32 %v469_v56, %v332_v58 }
 0x168   :  { %v450_v16 = vpop.f32.mrf.mxu0  ;;  %v615_v14 = vmul.f32 %v1718_v38, %v1688_v15 }
 0x169   :  { %v1690_v17 = vpop.f32.mrf.mxu1  ;;  %v471_v2 = vmul.f32 %v468_v37, %v450_v16  ;;  %v478_v11 = vadd.f32 %v470_v61, %v333_v63  ;;  %v622_v15 = vadd.f32 %v614_v12, %v477_v9 }
 0x16a   :  { %v452_v18 = vpop.f32.mrf.mxu0  ;;  %v616_v41 = vmul.f32 %v1718_v38, %v1690_v17 }
 0x16b   :  { %v1692_v19 = vpop.f32.mrf.mxu1  ;;  %v472_v5 = vmul.f32 %v468_v37, %v452_v18  ;;  %v479_v16 = vadd.f32 %v471_v2, %v334_v0 }
 0x16c   :  { %v456_v20 = vpop.f32.mrf.mxu0  ;;  %v617_v13 = vmul.f32 %v1718_v38, %v1692_v19 }
 0x16d   :  { %v1694_v21 = vpop.f32.mrf.mxu1  ;;  %v473_v40 = vmul.f32 %v468_v37, %v456_v20  ;;  %v480_v42 = vadd.f32 %v472_v5, %v335_v1  ;;  %v624_v49 = vadd.f32 %v616_v41, %v479_v16 }
 0x16e   :  { %v458_v22 = vpop.f32.mrf.mxu0  ;;  %v618_v46 = vmul.f32 %v1718_v38, %v1694_v21 }
 0x16f   :  { %v1696_v23 = vpop.f32.mrf.mxu1  ;;  %v474_v6 = vmul.f32 %v468_v37, %v458_v22  ;;  %v1736_v22 = vstv %s1724_s11  ;;  %v625_v21 = vadd.f32 %v617_v13, %v480_v42 }
 0x170   :  { %v462_v24 = vpop.f32.mrf.mxu0  ;;  %v619_v43 = vmul.f32 %v1718_v38, %v1696_v23 }
 0x171   :  { %v1698_v25 = vpop.f32.mrf.mxu1  ;;  %v475_v34 = vmul.f32 %v468_v37, %v462_v24  ;;  %v482_v20 = vadd.f32 %v474_v6, %v337_v4  ;;  %v481_v24 = vadd.f32 %v473_v40, %v336_v3 }
 0x172   :  { %v1700_v26 = vpop.f32.mrf.mxu0  ;;  %v620_v47 = vmul.f32 %v1718_v38, %v1698_v25 }
 0x173   :  { %v1702_v27 = vpop.f32.mrf.mxu1  ;;  %v476_v18 = vmul.f32 %v468_v37, %v1700_v26  ;;  %v623_v26 = vadd.f32 %v615_v14, %v478_v11  ;;  %v483_v37 = vadd.f32 %v475_v34, %v338_v8  ;;  %v627_v52 = vadd.f32 %v619_v43, %v482_v20 }
 0x174   :  { %v621_v23 = vmul.f32 %v1718_v38, %v1702_v27  ;;  %v626_v25 = vadd.f32 %v618_v46, %v481_v24 }
 0x175   :  { %v484_v50 = vadd.f32 %v476_v18, %v339_v10  ;;  %v628_v27 = vadd.f32 %v620_v47, %v483_v37 }
 0x177   :  { %v629_v63 = vadd.f32 %v621_v23, %v484_v50 }
 0x1a4   :  { %v1704_v28 = vpop.f32.mrf.mxu0 }
 0x1a5   :  { %v1706_v29 = vpop.f32.mrf.mxu1  ;;  %v759_v51 = vmul.f32 %v1720_v39, %v1704_v28 }
 0x1a6   :  { %v1708_v30 = vpop.f32.mrf.mxu0 }
 0x1a7   :  { %v1710_v31 = vpop.f32.mrf.mxu1  ;;  %v760_v17 = vmul.f32 %v1720_v39, %v1708_v30 }
 0x1a8   :  { %v1712_v32 = vpop.f32.mrf.mxu0  ;;  %v905_v58 = vmul.f32 %v1726_v57, %v1710_v31 }
 0x1a9   :  { %v1714_v33 = vpop.f32.mrf.mxu1  ;;  %v761_v30 = vmul.f32 %v1720_v39, %v1712_v32  ;;  %v768_v56 = vadd.f32 %v760_v17, %v623_v26  ;;  %v767_v32 = vadd.f32 %v759_v51, %v622_v15 }
 0x1aa   :  { %v1716_v36 = vpop.f32.mrf.mxu0  ;;  %v906_v31 = vmul.f32 %v1726_v57, %v1714_v33 }
 0x1ab   :  { %v1722_v44 = vpop.f32.mrf.mxu1  ;;  %v762_v59 = vmul.f32 %v1720_v39, %v1716_v36  ;;  %v769_v1 = vadd.f32 %v761_v30, %v624_v49  ;;  %v913_v5 = vadd.f32 %v905_v58, %v768_v56 }
 0x1ac   :  { %v746_v53 = vpop.f32.mrf.mxu0 }
 0x1ad   :  { %v891_v62 = vpop.f32.mrf.mxu1  ;;  %v763_v54 = vmul.f32 %v1720_v39, %v746_v53  ;;  %v904_v53 = vmul.f32 %v1726_v57, %v1706_v29  ;;  %v770_v6 = vadd.f32 %v762_v59, %v625_v21  ;;  %v914_v20 = vadd.f32 %v906_v31, %v769_v1 }
 0x1ae   :  { %v748_v7 = vpop.f32.mrf.mxu0  ;;  %v908_v36 = vmul.f32 %v1726_v57, %v891_v62 }
 0x1af   :  { %v893_v35 = vpop.f32.mrf.mxu1  ;;  %v764_v19 = vmul.f32 %v1720_v39, %v748_v7  ;;  %v771_v2 = vadd.f32 %v763_v54, %v626_v25  ;;  %v907_v7 = vmul.f32 %v1726_v57, %v1722_v44  ;;  %v912_v34 = vadd.f32 %v904_v53, %v767_v32 }
 0x1b0   :  { %v752_v45 = vpop.f32.mrf.mxu0  ;;  %v909_v60 = vmul.f32 %v1726_v57, %v893_v35 }
 0x1b1   :  { %v897_v48 = vpop.f32.mrf.mxu1  ;;  %v772_v38 = vadd.f32 %v764_v19, %v627_v52  ;;  %v765_v28 = vmul.f32 %v1720_v39, %v752_v45  ;;  %v916_v35 = vadd.f32 %v908_v36, %v771_v2  ;;  %v915_v43 = vadd.f32 %v907_v7, %v770_v6 }
 0x1b2   :  { %v754_v55 = vpop.f32.mrf.mxu0  ;;  %v910_v8 = vmul.f32 %v1726_v57, %v897_v48 }
 0x1b3   :  { %v899_v61 = vpop.f32.mrf.mxu1  ;;  %v766_v0 = vmul.f32 %v1720_v39, %v754_v55  ;;  %v773_v9 = vadd.f32 %v765_v28, %v628_v27  ;;  %v917_v29 = vadd.f32 %v909_v60, %v772_v38 }
 0x1b4   :  { %v911_v62 = vmul.f32 %v1726_v57, %v899_v61 }
 0x1b5   :  { %v774_v10 = vadd.f32 %v766_v0, %v629_v63  ;;  %v918_v46 = vadd.f32 %v910_v8, %v773_v9 }
 0x1b7   :  { %v919_v17 = vadd.f32 %v911_v62, %v774_v10  ;;  %v1133_v10 = vlaneseq }
 0x1e4   :  { %v1024_v3 = vpop.f32.mrf.mxu0 }
 0x1e5   :  { %v1036_v4 = vpop.f32.mrf.mxu1  ;;  %v1049_v39 = vmul.f32 %v1736_v22, %v1024_v3 }
 0x1e6   :  { %v1053_v12 = vmul.f32 %v1736_v22, %v1036_v4  ;;  %v1026_v40 = vpop.f32.mrf.mxu0 }
 0x1e7   :  { %v1038_v33 = vpop.f32.mrf.mxu1  ;;  %v1050_v11 = vmul.f32 %v1736_v22, %v1026_v40  ;;  %v1057_v57 = vadd.f32 %v1049_v39, %v912_v34 }
 0x1e8   :  { %v1054_v14 = vmul.f32 %v1736_v22, %v1038_v33  ;;  %v1030_v44 = vpop.f32.mrf.mxu0  ;;  %v1061_v24 = vadd.f32 %v1053_v12, %v916_v35 }
 0x1e9   :  { %v1042_v16 = vpop.f32.mrf.mxu1  ;;  %v1051_v41 = vmul.f32 %v1736_v22, %v1030_v44  ;;  %v1058_v13 = vadd.f32 %v1050_v11, %v913_v5  ;;  %v1134_v44 = vshrl.u32 %v1133_v10, 7 }
 0x1ea   :  { %v1055_v18 = vmul.f32 %v1736_v22, %v1042_v16  ;;  %v1062_v42 = vadd.f32 %v1054_v14, %v917_v29  ;;  %v1032_v45 = vpop.f32.mrf.mxu0 }
 0x1eb   :  { %v1044_v15 = vpop.f32.mrf.mxu1  ;;  %v1052_v26 = vmul.f32 %v1736_v22, %v1032_v45  ;;  %v1067_v19 = vadd.f32 %v1058_v13, %v1057_v57  ;;  %v1059_v48 = vadd.f32 %v1051_v41, %v914_v20  ;;  %v1135_v41 = vsub.s32 0, %v1134_v44 }
 0x1ec   :  { %v1056_v37 = vmul.f32 %v1736_v22, %v1044_v15  ;;  %v1073_v47 = vadd.f32 %v1062_v42, %v1061_v24  ;;  %v1063_v49 = vadd.f32 %v1055_v18, %v918_v46  ;;  %v1139_v18 = vsub.s32 1, %v1134_v44 }
 0x1ed   :  { %v1060_v50 = vadd.f32 %v1052_v26, %v915_v43  ;;  %1068 = vadd.xlane.f32.xlu0 %v1067_v19 }
 0x1ee   :  { %v1064_v23 = vadd.f32 %v1056_v37, %v919_v17  ;;  %1074 = vadd.xlane.f32.xlu1 %v1073_v47 }
 0x1ef   :  { %v1070_v51 = vadd.f32 %v1060_v50, %v1059_v48 }
 0x1f0   :  { %v1076_v21 = vadd.f32 %v1064_v23, %v1063_v49 }
 0x1f1   :  { %1071 = vadd.xlane.f32.xlu0 %v1070_v51 }
 0x1f2   :  { %1077 = vadd.xlane.f32.xlu1 %v1076_v21 }
 0x276   :  { %v1069_v30 = vpop.xlane.xlu0 %1068 }
 0x277   :  { %v1075_v52 = vpop.xlane.xlu1 %1074  ;;  %v1080_v55 = vmul.f32 0.00390625, %v1069_v30 }
 0x278   :  { %v1082_v54 = vmul.f32 0.00390625, %v1075_v52 }
 0x279   :  { %v1084_v25 = vsub.f32 %v1057_v57, %v1080_v55  ;;  %v1085_v56 = vsub.f32 %v1058_v13, %v1080_v55  ;;  %v1066_v13 = vld [vmem:[%s1813_s4] sm:$0x3] }
 0x27a   :  { %v1780_v58 = vsub.f32 %v1061_v24, %v1082_v54  ;;  %v1782_v22 = vsub.f32 %v1062_v42, %v1082_v54  ;;  %v1072_v59 = vpop.xlane.xlu0 %1071  ;;  %v1065_v42 = vld [vmem:[%s1812_s3] sm:$0x3]  ;;  %v1155_v15 = vrot.slane %v1066_v13, %v1135_v41  ;;  %v1159_v24 = vrot.slane %v1066_v13, %v1139_v18  ;;  %s1612_s3 = smov [#allocation9]  }
 0x27b   :  { %v1078_v27 = vpop.xlane.xlu1 %1077  ;;  %v1081_v38 = vmul.f32 0.00390625, %v1072_v59  ;;  %v1092_v60 = vmul.f32 %v1084_v25, %v1084_v25  ;;  %v1093_v61 = vmul.f32 %v1085_v56, %v1085_v56  ;;  %v1136_v20 = vrot.slane %v1065_v42, %v1135_v41  ;;  %s1183_s4 = sshll.u32 %s1612_s3, 4  ;;  %s1184_s4 = int_to_ptr.vmem [resolvable:$true] %s1183_s4 }
 0x27c   :  { %v1083_v28 = vmul.f32 0.00390625, %v1078_v27  ;;  %v1096_v31 = vmul.f32 %v1780_v58, %v1780_v58  ;;  %v1097_v2 = vmul.f32 %v1782_v22, %v1782_v22  ;;  %v1140_v43 = vrot.slane %v1065_v42, %v1139_v18  ;;  %s1579_s16 = scalar_lea.vmem %s1184_s4, 1024  ;;  %p1584_p11 = scmp.lt.s32.totalorder %s1184_s4, %s1184_s4 }
 0x27d   :  { %v1086_v63 = vsub.f32 %v1059_v48, %v1081_v38  ;;  %v1087_v32 = vsub.f32 %v1060_v50, %v1081_v38  ;;  %v1100_v1 = vadd.f32 %v1093_v61, %v1092_v60  ;;  %p1580_p10 = scmp.ne.s32.totalorder %s1184_s4, %s1579_s16  ;;  %p1585_p12 = scmp.lt.s32.totalorder %s1579_s16, %s1579_s16 }
 0x27e   :  { %v1784_v53 = vsub.f32 %v1063_v49, %v1083_v28  ;;  %v1786_v0 = vsub.f32 %v1064_v23, %v1083_v28  ;;  %v1106_v7 = vadd.f32 %v1097_v2, %v1096_v31 }
 0x27f   :  { %v1094_v36 = vmul.f32 %v1086_v63, %v1086_v63  ;;  %v1095_v3 = vmul.f32 %v1087_v32, %v1087_v32  ;;  %1101 = vadd.xlane.f32.xlu0 %v1100_v1  ;;  %p1586_p13 = por %p1585_p12, %p1584_p11 }
 0x280   :  { %v1098_v5 = vmul.f32 %v1784_v53, %v1784_v53  ;;  %v1099_v6 = vmul.f32 %v1786_v0, %v1786_v0 }
 0x281   :  { %v1103_v4 = vadd.f32 %v1095_v3, %v1094_v36  ;;  %p1587_p0 = pnand %p1586_p13, %p1580_p10 }
 0x282   :  { %v1109_v8 = vadd.f32 %v1099_v6, %v1098_v5 }
 0x283   :  { %1104 = vadd.xlane.f32.xlu1 %v1103_v4  ;;  %1107 = vadd.xlane.f32.xlu0 %v1106_v7 }
 0x287   :  { %1110 = vadd.xlane.f32.xlu1 %v1109_v8 }
 0x308   :  { %v1102_v9 = vpop.xlane.xlu0 %1101 }
 0x309   :  { %v1112_v29 = vmul.f32 0.00390625, %v1102_v9 }
 0x30b   :  { %v1116_v39 = vadd.f32 1e-05, %v1112_v29 }
 0x30c   :  { %v1105_v12 = vpop.xlane.xlu1 %1104  ;;  %v1108_v40 = vpop.xlane.xlu0 %1107 }
 0x30d   :  { %v1113_v33 = vmul.f32 0.00390625, %v1105_v12  ;;  %1523 = vrsqrt.f32 %v1116_v39  ;;  %v1114_v62 = vmul.f32 0.00390625, %v1108_v40 }
 0x30f   :  { %v1117_v11 = vadd.f32 1e-05, %v1113_v33  ;;  %v1118_v14 = vadd.f32 1e-05, %v1114_v62 }
 0x310   :  { %v1111_v34 = vpop.xlane.xlu1 %1110 }
 0x311   :  { %1525 = vrsqrt.f32 %v1117_v11  ;;  %v1115_v35 = vmul.f32 0.00390625, %v1111_v34 }
 0x312   :  { %1527 = vrsqrt.f32 %v1118_v14 }
 0x313   :  { %v1119_v16 = vadd.f32 1e-05, %v1115_v35 }
 0x315   :  { %1529 = vrsqrt.f32 %v1119_v16 }
 0x31a   :  { %v1524_v45 = vpop.eup %1523 }
 0x31b   :  { %v1124_v57 = vmul.f32 %v1524_v45, %v1084_v25  ;;  %v1125_v46 = vmul.f32 %v1524_v45, %v1085_v56 }
 0x31d   :  { %v1143_v26 = vmul.f32 %v1136_v20, %v1124_v57  ;;  %v1144_v37 = vmul.f32 %v1140_v43, %v1125_v46 }
 0x31e   :  { %v1526_v17 = vpop.eup %1525 }
 0x31f   :  { %v1528_v47 = vpop.eup %1527  ;;  %v1126_v19 = vmul.f32 %v1526_v17, %v1086_v63  ;;  %v1127_v48 = vmul.f32 %v1526_v17, %v1087_v32  ;;  %v1162_v49 = vadd.f32 %v1155_v15, %v1143_v26  ;;  %v1163_v50 = vadd.f32 %v1159_v24, %v1144_v37 }
 0x320   :  { %v1128_v23 = vmul.f32 %v1528_v47, %v1780_v58  ;;  %v1129_v51 = vmul.f32 %v1528_v47, %v1782_v22 }
 0x321   :  { %v1145_v21 = vmul.f32 %v1136_v20, %v1126_v19  ;;  %v1146_v52 = vmul.f32 %v1140_v43, %v1127_v48  ;;  %1170 = vst [vmem:[#allocation9] sm:$0xff] %v1162_v49  ;;  %1171 = vst [vmem:[#allocation9 + $0x8] sm:$0xff] %v1163_v50 }
 0x322   :  { %v1530_v30 = vpop.eup %1529  ;;  %v1147_v54 = vmul.f32 %v1136_v20, %v1128_v23  ;;  %v1148_v55 = vmul.f32 %v1140_v43, %v1129_v51 }
 0x323   :  { %v1164_v25 = vadd.f32 %v1155_v15, %v1145_v21  ;;  %v1165_v56 = vadd.f32 %v1159_v24, %v1146_v52  ;;  %v1130_v59 = vmul.f32 %v1530_v30, %v1784_v53  ;;  %v1131_v27 = vmul.f32 %v1530_v30, %v1786_v0 }
 0x324   :  { %v1166_v38 = vadd.f32 %v1155_v15, %v1147_v54  ;;  %v1167_v28 = vadd.f32 %v1159_v24, %v1148_v55 }
 0x325   :  { %1172 = vst [vmem:[#allocation9 + $0x10] sm:$0xff] %v1164_v25  ;;  %1173 = vst [vmem:[#allocation9 + $0x18] sm:$0xff] %v1165_v56  ;;  %v1149_v58 = vmul.f32 %v1136_v20, %v1130_v59  ;;  %v1150_v22 = vmul.f32 %v1140_v43, %v1131_v27 }
 0x326   :  { %1174 = vst [vmem:[#allocation9 + $0x20] sm:$0xff] %v1166_v38  ;;  %1175 = vst [vmem:[#allocation9 + $0x28] sm:$0xff] %v1167_v28 }
 0x327   :  { %v1168_v60 = vadd.f32 %v1155_v15, %v1149_v58  ;;  %v1169_v61 = vadd.f32 %v1159_v24, %v1150_v22 }
 0x329   :  { %1176 = vst [vmem:[#allocation9 + $0x30] sm:$0xff] %v1168_v60  ;;  %1177 = vst [vmem:[#allocation9 + $0x38] sm:$0xff] %v1169_v61 }
 0x32a   :  { %1590 = shalt.err (!%p1587_p0)
}
 0x32b   :  { %s1613_s17 = smov 256   ;;  %s1614_s18 = smov 16  }
 0x32c   :  { %1189 = dma.vmem_to_hbm [thread:$0]  %s1184_s4, 1024, %s1814_s5, [#allocation4], %s1613_s17, %s1613_s17, %s1614_s18  }
 0x32d   :  { %1605 = dma.done.wait [#allocation4], 1024  }
 0x32e   :  { %1606 = vsyncadd [#allocation4], 4294966272 }
 0x32f   :  { %1193 = vsyncpa [#allocation3], 1 }
 0x330   :  { %1194 = vsyncpa [#allocation8], 1 }
 0x331   :  { %1195 = vsyncpa [#allocation4], 1 }
 0x332   :  { %1196 = vsyncpa [#allocation5], 1 }

</bundles_post_ra>
